<compile_context>
chip_gen: v6e
topology: v6e:2x2x1
jax: 0.10.0
libtpu: 0.0.40
codegen_flags: <defaults>
</compile_context>

<pallas_src>
import math

import jax
import jax.numpy as jnp
from jax.experimental import pallas as pl
from jax.experimental.pallas import tpu as pltpu

# ----------------------------- config ---------------------------------------
VOCAB = 100
MAX_POS = 64
HIDDEN = 32
N_LAYERS = 2
N_HEADS = 4
HEAD_DIM = HIDDEN // N_HEADS
INTERMEDIATE = 64
N_CLASSES = 3
CLS_PAD = 128            # lane-dense padded classifier output width
PAD_IDX = 1              # roberta padding_idx (used for position-id offset)
LN_EPS = 1e-5
ATT_SCALE = 1.0 / math.sqrt(HEAD_DIM)

BATCH = 2
SEQ = 8


# ----------------------------- fused Pallas kernel ---------------------------
def _layernorm(x, g, b):
    mean = jnp.mean(x, axis=-1, keepdims=True)
    var = jnp.mean((x - mean) ** 2, axis=-1, keepdims=True)
    return (x - mean) * jax.lax.rsqrt(var + LN_EPS) * g + b


def _roberta_fused_kernel(
    emb_ref, mask_ref,
    emb_ln_g_ref, emb_ln_b_ref,
    qkv_w_ref, qkv_b_ref,
    ao_w_ref, ao_b_ref, ao_ln_g_ref, ao_ln_b_ref,
    i_w_ref, i_b_ref,
    o_w_ref, o_b_ref, o_ln_g_ref, o_ln_b_ref,
    pre_w_ref, pre_b_ref,
    cls_w_ref, cls_b_ref,
    out_ref,
):
    """One batch element per grid step; all activations VMEM/vreg resident."""
    x = emb_ref[0].astype(jnp.float32)                               # (S, HIDDEN)
    # additive key mask: 0 on real tokens, -10000 on padded keys      (1, S)
    bias = (1.0 - mask_ref[0].astype(jnp.float32)) * -10000.0

    x = _layernorm(x, emb_ln_g_ref[...], emb_ln_b_ref[...])

    for l in range(N_LAYERS):                                        # static unroll
        # ---- fused QKV projection: (S, H) @ (H, 3H) ----
        qkv = jnp.dot(x.astype(jnp.bfloat16), qkv_w_ref[l],
                      preferred_element_type=jnp.float32) + qkv_b_ref[l]
        q = qkv[:, 0 * HIDDEN:1 * HIDDEN]
        k = qkv[:, 1 * HIDDEN:2 * HIDDEN]
        v = qkv[:, 2 * HIDDEN:3 * HIDDEN]

        # ---- all heads of this batch element, unrolled (no JAX-side transposes) ----
        ctx_parts = []
        for h in range(N_HEADS):
            sl = slice(h * HEAD_DIM, (h + 1) * HEAD_DIM)
            qh, kh, vh = q[:, sl], k[:, sl], v[:, sl]                # (S, D)
            s = jnp.dot(qh, kh.T, preferred_element_type=jnp.float32) * ATT_SCALE
            s = s + bias                                             # (S,S) + (1,S)
            m = jnp.max(s, axis=-1, keepdims=True)
            p = jnp.exp(s - m)
            p = p * pl.reciprocal(jnp.sum(p, axis=-1, keepdims=True), approx=True)
            ctx_parts.append(jnp.dot(p, vh, preferred_element_type=jnp.float32))
        ctx = jnp.concatenate(ctx_parts, axis=-1)                    # (S, HIDDEN)

        # ---- attention output projection + residual + LN ----
        attn_out = jnp.dot(ctx.astype(jnp.bfloat16), ao_w_ref[l],
                           preferred_element_type=jnp.float32) + ao_b_ref[l]
        x = _layernorm(attn_out + x, ao_ln_g_ref[l], ao_ln_b_ref[l])

        # ---- FFN + residual + LN ----
        inter = jnp.dot(x.astype(jnp.bfloat16), i_w_ref[l],
                        preferred_element_type=jnp.float32) + i_b_ref[l]
        inter = jax.nn.gelu(inter, approximate=True)                 # EUP tanh-gelu
        ffn_out = jnp.dot(inter.astype(jnp.bfloat16), o_w_ref[l],
                          preferred_element_type=jnp.float32) + o_b_ref[l]
        x = _layernorm(ffn_out + x, o_ln_g_ref[l], o_ln_b_ref[l])

    # ---- classification head on the [CLS] token ----
    cls = x[0:1, :]                                                  # (1, HIDDEN)
    pooled = jnp.dot(cls.astype(jnp.bfloat16), pre_w_ref[...],
                     preferred_element_type=jnp.float32) + pre_b_ref[...]
    pooled = jnp.maximum(pooled, 0.0)                                # ReLU
    # TODO(synk): Dropout(p=0.3) is identity in eval/inference mode; omitted.
    logits = jnp.dot(pooled.astype(jnp.bfloat16), cls_w_ref[...],
                     preferred_element_type=jnp.float32) + cls_b_ref[...]
    out_ref[0] = logits.astype(out_ref.dtype)                        # (1, 128) lane-dense store


# ----------------------------- params ----------------------------------------
def init_params(key):
    keys = iter(jax.random.split(key, 64))

    def nrm(shape, scale=0.02):
        return jax.random.normal(next(keys), shape, jnp.float32) * scale

    L = N_LAYERS
    params = {
        "word_emb": nrm((VOCAB, HIDDEN)),
        "pos_emb": nrm((MAX_POS, HIDDEN)),
        "type_emb": nrm((2, HIDDEN)),
        "emb_ln_g": jnp.ones((1, HIDDEN), jnp.float32),
        "emb_ln_b": jnp.zeros((1, HIDDEN), jnp.float32),
        # per-layer weights stacked along a leading layer axis; matmul weights in bf16
        "qkv_w": nrm((L, HIDDEN, 3 * HIDDEN)).astype(jnp.bfloat16),
        "qkv_b": jnp.zeros((L, 1, 3 * HIDDEN), jnp.float32),
        "ao_w": nrm((L, HIDDEN, HIDDEN)).astype(jnp.bfloat16),
        "ao_b": jnp.zeros((L, 1, HIDDEN), jnp.float32),
        "ao_ln_g": jnp.ones((L, 1, HIDDEN), jnp.float32),
        "ao_ln_b": jnp.zeros((L, 1, HIDDEN), jnp.float32),
        "i_w": nrm((L, HIDDEN, INTERMEDIATE)).astype(jnp.bfloat16),
        "i_b": jnp.zeros((L, 1, INTERMEDIATE), jnp.float32),
        "o_w": nrm((L, INTERMEDIATE, HIDDEN)).astype(jnp.bfloat16),
        "o_b": jnp.zeros((L, 1, HIDDEN), jnp.float32),
        "o_ln_g": jnp.ones((L, 1, HIDDEN), jnp.float32),
        "o_ln_b": jnp.zeros((L, 1, HIDDEN), jnp.float32),
        "pre_w": nrm((HIDDEN, HIDDEN)).astype(jnp.bfloat16),
        "pre_b": jnp.zeros((1, HIDDEN), jnp.float32),
    }
    # classifier weights zero-padded to a lane-dense 128-wide output; sliced to 3 outside
    cls_w = nrm((HIDDEN, N_CLASSES))
    params["cls_w_pad"] = (
        jnp.zeros((HIDDEN, CLS_PAD), jnp.float32).at[:, :N_CLASSES].set(cls_w)
    ).astype(jnp.bfloat16)
    params["cls_b_pad"] = jnp.zeros((1, CLS_PAD), jnp.float32)
    return params


# ----------------------------- forward ---------------------------------------
def roberta_class_forward(params, input_ids, attention_mask):
    """Mirrors RobertaClass.forward (eval mode)."""
    B, S = input_ids.shape
    mask_i = attention_mask.astype(jnp.int32)

    # roberta position ids: cumsum of mask offset by padding_idx
    position_ids = jnp.cumsum(mask_i, axis=1) * mask_i + PAD_IDX

    # embedding gather kept in plain JAX glue (data-dependent gather)
    emb = (params["word_emb"][input_ids]
           + params["pos_emb"][position_ids]
           + params["type_emb"][0][None, None, :])                   # (B, S, HIDDEN)

    mask_f = attention_mask.astype(jnp.float32).reshape(B, 1, S)

    def full(shape):
        return pl.BlockSpec(shape, lambda b: (0,) * len(shape))

    out = pl.pallas_call(
        _roberta_fused_kernel,
        out_shape=jax.ShapeDtypeStruct((B, 1, CLS_PAD), jnp.float32),
        grid=(B,),
        in_specs=[
            pl.BlockSpec((1, S, HIDDEN), lambda b: (b, 0, 0)),       # embeddings
            pl.BlockSpec((1, 1, S), lambda b: (b, 0, 0)),            # attention mask
            full((1, HIDDEN)), full((1, HIDDEN)),                    # embedding LN
            full((N_LAYERS, HIDDEN, 3 * HIDDEN)), full((N_LAYERS, 1, 3 * HIDDEN)),
            full((N_LAYERS, HIDDEN, HIDDEN)), full((N_LAYERS, 1, HIDDEN)),
            full((N_LAYERS, 1, HIDDEN)), full((N_LAYERS, 1, HIDDEN)),
            full((N_LAYERS, HIDDEN, INTERMEDIATE)), full((N_LAYERS, 1, INTERMEDIATE)),
            full((N_LAYERS, INTERMEDIATE, HIDDEN)), full((N_LAYERS, 1, HIDDEN)),
            full((N_LAYERS, 1, HIDDEN)), full((N_LAYERS, 1, HIDDEN)),
            full((HIDDEN, HIDDEN)), full((1, HIDDEN)),
            full((HIDDEN, CLS_PAD)), full((1, CLS_PAD)),
        ],
        out_specs=pl.BlockSpec((1, 1, CLS_PAD), lambda b: (b, 0, 0)),
        compiler_params=pltpu.CompilerParams(
            dimension_semantics=("parallel",)),                      # v7x: 2 TCs
    )(emb, mask_f,
      params["emb_ln_g"], params["emb_ln_b"],
      params["qkv_w"], params["qkv_b"],
      params["ao_w"], params["ao_b"], params["ao_ln_g"], params["ao_ln_b"],
      params["i_w"], params["i_b"],
      params["o_w"], params["o_b"], params["o_ln_g"], params["o_ln_b"],
      params["pre_w"], params["pre_b"],
      params["cls_w_pad"], params["cls_b_pad"])

    return out.reshape(B, CLS_PAD)[:, :N_CLASSES]                    # (B, 3)


# ----------------------------- main ------------------------------------------
if __name__ == "__main__":
    key = jax.random.PRNGKey(0)
    k_param, k_ids = jax.random.split(key)

    params = init_params(k_param)
    input_ids = jax.random.randint(k_ids, (BATCH, SEQ), minval=3, maxval=VOCAB,
                                   dtype=jnp.int32)
    attention_mask = jnp.ones((BATCH, SEQ), jnp.int32).at[1, -2:].set(0)

    fwd = jax.jit(roberta_class_forward)
    logits = fwd(params, input_ids, attention_mask)
    jax.block_until_ready(logits)

    assert logits.shape == (BATCH, N_CLASSES)
    assert bool(jnp.all(jnp.isfinite(logits)))
    print("KERNEL_OK")
</pallas_src>

<mosaic_0001>
module attributes {stable_mosaic.version = 11 : i64} {
  func.func @_roberta_fused_kernel(%arg0: i32, %arg1: memref<1x8x32xf32, #tpu.memory_space<vmem>>, %arg2: memref<1x1x8xf32, #tpu.memory_space<vmem>>, %arg3: memref<1x32xf32, #tpu.memory_space<vmem>>, %arg4: memref<1x32xf32, #tpu.memory_space<vmem>>, %arg5: memref<2x32x96xbf16, #tpu.memory_space<vmem>>, %arg6: memref<2x1x96xf32, #tpu.memory_space<vmem>>, %arg7: memref<2x32x32xbf16, #tpu.memory_space<vmem>>, %arg8: memref<2x1x32xf32, #tpu.memory_space<vmem>>, %arg9: memref<2x1x32xf32, #tpu.memory_space<vmem>>, %arg10: memref<2x1x32xf32, #tpu.memory_space<vmem>>, %arg11: memref<2x32x64xbf16, #tpu.memory_space<vmem>>, %arg12: memref<2x1x64xf32, #tpu.memory_space<vmem>>, %arg13: memref<2x64x32xbf16, #tpu.memory_space<vmem>>, %arg14: memref<2x1x32xf32, #tpu.memory_space<vmem>>, %arg15: memref<2x1x32xf32, #tpu.memory_space<vmem>>, %arg16: memref<2x1x32xf32, #tpu.memory_space<vmem>>, %arg17: memref<32x32xbf16, #tpu.memory_space<vmem>>, %arg18: memref<1x32xf32, #tpu.memory_space<vmem>>, %arg19: memref<32x128xbf16, #tpu.memory_space<vmem>>, %arg20: memref<1x128xf32, #tpu.memory_space<vmem>>, %arg21: memref<1x1x128xf32, #tpu.memory_space<vmem>>) attributes {dimension_semantics = [#tpu.dimension_semantics<parallel>], iteration_bounds = array<i64: 2>, scalar_prefetch = 0 : i64, scratch_operands = 0 : i64, tpu.core_type = #tpu.core_type<tc>, window_params = [{transform_indices = @transform_0, window_bounds = array<i64: 1, 8, 32>}, {transform_indices = @transform_1, window_bounds = array<i64: 1, 1, 8>}, {pipeline_mode = #tpu.pipeline_mode<synchronous>, transform_indices = @transform_2, window_bounds = array<i64: 1, 32>}, {pipeline_mode = #tpu.pipeline_mode<synchronous>, transform_indices = @transform_3, window_bounds = array<i64: 1, 32>}, {pipeline_mode = #tpu.pipeline_mode<synchronous>, transform_indices = @transform_4, window_bounds = array<i64: 2, 32, 96>}, {pipeline_mode = #tpu.pipeline_mode<synchronous>, transform_indices = @transform_5, window_bounds = array<i64: 2, 1, 96>}, {pipeline_mode = #tpu.pipeline_mode<synchronous>, transform_indices = @transform_6, window_bounds = array<i64: 2, 32, 32>}, {pipeline_mode = #tpu.pipeline_mode<synchronous>, transform_indices = @transform_7, window_bounds = array<i64: 2, 1, 32>}, {pipeline_mode = #tpu.pipeline_mode<synchronous>, transform_indices = @transform_8, window_bounds = array<i64: 2, 1, 32>}, {pipeline_mode = #tpu.pipeline_mode<synchronous>, transform_indices = @transform_9, window_bounds = array<i64: 2, 1, 32>}, {pipeline_mode = #tpu.pipeline_mode<synchronous>, transform_indices = @transform_10, window_bounds = array<i64: 2, 32, 64>}, {pipeline_mode = #tpu.pipeline_mode<synchronous>, transform_indices = @transform_11, window_bounds = array<i64: 2, 1, 64>}, {pipeline_mode = #tpu.pipeline_mode<synchronous>, transform_indices = @transform_12, window_bounds = array<i64: 2, 64, 32>}, {pipeline_mode = #tpu.pipeline_mode<synchronous>, transform_indices = @transform_13, window_bounds = array<i64: 2, 1, 32>}, {pipeline_mode = #tpu.pipeline_mode<synchronous>, transform_indices = @transform_14, window_bounds = array<i64: 2, 1, 32>}, {pipeline_mode = #tpu.pipeline_mode<synchronous>, transform_indices = @transform_15, window_bounds = array<i64: 2, 1, 32>}, {pipeline_mode = #tpu.pipeline_mode<synchronous>, transform_indices = @transform_16, window_bounds = array<i64: 32, 32>}, {pipeline_mode = #tpu.pipeline_mode<synchronous>, transform_indices = @transform_17, window_bounds = array<i64: 1, 32>}, {pipeline_mode = #tpu.pipeline_mode<synchronous>, transform_indices = @transform_18, window_bounds = array<i64: 32, 128>}, {pipeline_mode = #tpu.pipeline_mode<synchronous>, transform_indices = @transform_19, window_bounds = array<i64: 1, 128>}, {transform_indices = @transform_20, window_bounds = array<i64: 1, 1, 128>}]} {
    %c0 = arith.constant 0 : index
    %c0_0 = arith.constant 0 : index
    %c0_1 = arith.constant 0 : index
    %0 = vector.load %arg1[%c0, %c0_0, %c0_1] : memref<1x8x32xf32, #tpu.memory_space<vmem>>, vector<1x8x32xf32>
    %1 = vector.shape_cast %0 : vector<1x8x32xf32> to vector<8x32xf32>
    %c0_2 = arith.constant 0 : index
    %c0_3 = arith.constant 0 : index
    %c0_4 = arith.constant 0 : index
    %2 = vector.load %arg2[%c0_2, %c0_3, %c0_4] : memref<1x1x8xf32, #tpu.memory_space<vmem>>, vector<1x1x8xf32>
    %3 = vector.shape_cast %2 : vector<1x1x8xf32> to vector<1x8xf32>
    %cst = arith.constant 1.000000e+00 : f32
    %4 = vector.broadcast %cst : f32 to vector<1x8xf32>
    %5 = arith.subf %4, %3 : vector<1x8xf32>
    %cst_5 = arith.constant -1.000000e+04 : f32
    %6 = vector.broadcast %cst_5 : f32 to vector<1x8xf32>
    %7 = arith.mulf %5, %6 : vector<1x8xf32>
    %c0_6 = arith.constant 0 : index
    %c0_7 = arith.constant 0 : index
    %8 = vector.load %arg3[%c0_6, %c0_7] : memref<1x32xf32, #tpu.memory_space<vmem>>, vector<1x32xf32>
    %c0_8 = arith.constant 0 : index
    %c0_9 = arith.constant 0 : index
    %9 = vector.load %arg4[%c0_8, %c0_9] : memref<1x32xf32, #tpu.memory_space<vmem>>, vector<1x32xf32>
    %cst_10 = arith.constant dense<0.000000e+00> : vector<8xf32>
    %10 = vector.multi_reduction <add>, %1, %cst_10 [1] : vector<8x32xf32> to vector<8xf32>
    %11 = vector.shape_cast %10 : vector<8xf32> to vector<8x1xf32>
    %cst_11 = arith.constant 3.200000e+01 : f32
    %12 = vector.broadcast %cst_11 : f32 to vector<8x1xf32>
    %13 = arith.divf %11, %12 : vector<8x1xf32>
    %14 = vector.broadcast %13 : vector<8x1xf32> to vector<8x32xf32>
    %15 = arith.subf %1, %14 : vector<8x32xf32>
    %16 = arith.mulf %15, %15 : vector<8x32xf32>
    %cst_12 = arith.constant dense<0.000000e+00> : vector<8xf32>
    %17 = vector.multi_reduction <add>, %16, %cst_12 [1] : vector<8x32xf32> to vector<8xf32>
    %18 = vector.shape_cast %17 : vector<8xf32> to vector<8x1xf32>
    %cst_13 = arith.constant 3.200000e+01 : f32
    %19 = vector.broadcast %cst_13 : f32 to vector<8x1xf32>
    %20 = arith.divf %18, %19 : vector<8x1xf32>
    %21 = vector.broadcast %13 : vector<8x1xf32> to vector<8x32xf32>
    %22 = arith.subf %1, %21 : vector<8x32xf32>
    %cst_14 = arith.constant 9.99999974E-6 : f32
    %23 = vector.broadcast %cst_14 : f32 to vector<8x1xf32>
    %24 = arith.addf %20, %23 : vector<8x1xf32>
    %25 = math.rsqrt %24 : vector<8x1xf32>
    %26 = vector.broadcast %25 : vector<8x1xf32> to vector<8x32xf32>
    %27 = arith.mulf %22, %26 : vector<8x32xf32>
    %28 = vector.broadcast %8 : vector<1x32xf32> to vector<8x32xf32>
    %29 = arith.mulf %27, %28 : vector<8x32xf32>
    %30 = vector.broadcast %9 : vector<1x32xf32> to vector<8x32xf32>
    %31 = arith.addf %29, %30 : vector<8x32xf32>
    %32 = arith.truncf %31 : vector<8x32xf32> to vector<8x32xbf16>
    %c0_15 = arith.constant 0 : index
    %c0_16 = arith.constant 0 : index
    %c0_17 = arith.constant 0 : index
    %33 = vector.load %arg5[%c0_15, %c0_16, %c0_17] : memref<2x32x96xbf16, #tpu.memory_space<vmem>>, vector<1x32x96xbf16>
    %34 = vector.shape_cast %33 : vector<1x32x96xbf16> to vector<32x96xbf16>
    %cst_18 = arith.constant dense<0.000000e+00> : vector<8x96xf32>
    %35 = tpu.matmul %32, %34, %cst_18 {dimension_numbers = #tpu.dot_dimension_numbers<[1], [0], [0], [1], [0, 0, 1, 1], [], []>} : vector<8x32xbf16>, vector<32x96xbf16>, vector<8x96xf32> -> vector<8x96xf32>
    %c0_19 = arith.constant 0 : index
    %c0_20 = arith.constant 0 : index
    %c0_21 = arith.constant 0 : index
    %36 = vector.load %arg6[%c0_19, %c0_20, %c0_21] : memref<2x1x96xf32, #tpu.memory_space<vmem>>, vector<1x1x96xf32>
    %37 = vector.shape_cast %36 : vector<1x1x96xf32> to vector<1x96xf32>
    %38 = vector.broadcast %37 : vector<1x96xf32> to vector<8x96xf32>
    %39 = arith.addf %35, %38 : vector<8x96xf32>
    %40 = vector.extract_strided_slice %39 {offsets = [0, 0], sizes = [8, 32], strides = [1, 1]} : vector<8x96xf32> to vector<8x32xf32>
    %41 = vector.extract_strided_slice %39 {offsets = [0, 32], sizes = [8, 32], strides = [1, 1]} : vector<8x96xf32> to vector<8x32xf32>
    %42 = vector.extract_strided_slice %39 {offsets = [0, 64], sizes = [8, 32], strides = [1, 1]} : vector<8x96xf32> to vector<8x32xf32>
    %43 = vector.extract_strided_slice %40 {offsets = [0, 0], sizes = [8, 8], strides = [1, 1]} : vector<8x32xf32> to vector<8x8xf32>
    %44 = vector.extract_strided_slice %41 {offsets = [0, 0], sizes = [8, 8], strides = [1, 1]} : vector<8x32xf32> to vector<8x8xf32>
    %45 = vector.extract_strided_slice %42 {offsets = [0, 0], sizes = [8, 8], strides = [1, 1]} : vector<8x32xf32> to vector<8x8xf32>
    %46 = tpu.transpose %44, [1, 0] : vector<8x8xf32> -> vector<8x8xf32>
    %cst_22 = arith.constant dense<0.000000e+00> : vector<8x8xf32>
    %47 = tpu.matmul %43, %46, %cst_22 {dimension_numbers = #tpu.dot_dimension_numbers<[1], [0], [0], [1], [0, 0, 1, 1], [], []>} : vector<8x8xf32>, vector<8x8xf32>, vector<8x8xf32> -> vector<8x8xf32>
    %cst_23 = arith.constant 0.353553385 : f32
    %48 = vector.broadcast %cst_23 : f32 to vector<8x8xf32>
    %49 = arith.mulf %47, %48 : vector<8x8xf32>
    %50 = vector.broadcast %7 : vector<1x8xf32> to vector<8x8xf32>
    %51 = arith.addf %49, %50 : vector<8x8xf32>
    %cst_24 = arith.constant dense<0xFF800000> : vector<8xf32>
    %52 = vector.multi_reduction <maximumf>, %51, %cst_24 [1] : vector<8x8xf32> to vector<8xf32>
    %53 = vector.shape_cast %52 : vector<8xf32> to vector<8x1xf32>
    %54 = vector.broadcast %53 : vector<8x1xf32> to vector<8x8xf32>
    %55 = arith.subf %51, %54 : vector<8x8xf32>
    %56 = math.exp %55 : vector<8x8xf32>
    %cst_25 = arith.constant dense<0.000000e+00> : vector<8xf32>
    %57 = vector.multi_reduction <add>, %56, %cst_25 [1] : vector<8x8xf32> to vector<8xf32>
    %58 = vector.shape_cast %57 : vector<8xf32> to vector<8x1xf32>
    %59 = tpu.reciprocal %58 {approx = true} : vector<8x1xf32> -> vector<8x1xf32>
    %60 = vector.broadcast %59 : vector<8x1xf32> to vector<8x8xf32>
    %61 = arith.mulf %56, %60 : vector<8x8xf32>
    %cst_26 = arith.constant dense<0.000000e+00> : vector<8x8xf32>
    %62 = tpu.matmul %61, %45, %cst_26 {dimension_numbers = #tpu.dot_dimension_numbers<[1], [0], [0], [1], [0, 0, 1, 1], [], []>} : vector<8x8xf32>, vector<8x8xf32>, vector<8x8xf32> -> vector<8x8xf32>
    %63 = vector.extract_strided_slice %40 {offsets = [0, 8], sizes = [8, 8], strides = [1, 1]} : vector<8x32xf32> to vector<8x8xf32>
    %64 = vector.extract_strided_slice %41 {offsets = [0, 8], sizes = [8, 8], strides = [1, 1]} : vector<8x32xf32> to vector<8x8xf32>
    %65 = vector.extract_strided_slice %42 {offsets = [0, 8], sizes = [8, 8], strides = [1, 1]} : vector<8x32xf32> to vector<8x8xf32>
    %66 = tpu.transpose %64, [1, 0] : vector<8x8xf32> -> vector<8x8xf32>
    %cst_27 = arith.constant dense<0.000000e+00> : vector<8x8xf32>
    %67 = tpu.matmul %63, %66, %cst_27 {dimension_numbers = #tpu.dot_dimension_numbers<[1], [0], [0], [1], [0, 0, 1, 1], [], []>} : vector<8x8xf32>, vector<8x8xf32>, vector<8x8xf32> -> vector<8x8xf32>
    %cst_28 = arith.constant 0.353553385 : f32
    %68 = vector.broadcast %cst_28 : f32 to vector<8x8xf32>
    %69 = arith.mulf %67, %68 : vector<8x8xf32>
    %70 = vector.broadcast %7 : vector<1x8xf32> to vector<8x8xf32>
    %71 = arith.addf %69, %70 : vector<8x8xf32>
    %cst_29 = arith.constant dense<0xFF800000> : vector<8xf32>
    %72 = vector.multi_reduction <maximumf>, %71, %cst_29 [1] : vector<8x8xf32> to vector<8xf32>
    %73 = vector.shape_cast %72 : vector<8xf32> to vector<8x1xf32>
    %74 = vector.broadcast %73 : vector<8x1xf32> to vector<8x8xf32>
    %75 = arith.subf %71, %74 : vector<8x8xf32>
    %76 = math.exp %75 : vector<8x8xf32>
    %cst_30 = arith.constant dense<0.000000e+00> : vector<8xf32>
    %77 = vector.multi_reduction <add>, %76, %cst_30 [1] : vector<8x8xf32> to vector<8xf32>
    %78 = vector.shape_cast %77 : vector<8xf32> to vector<8x1xf32>
    %79 = tpu.reciprocal %78 {approx = true} : vector<8x1xf32> -> vector<8x1xf32>
    %80 = vector.broadcast %79 : vector<8x1xf32> to vector<8x8xf32>
    %81 = arith.mulf %76, %80 : vector<8x8xf32>
    %cst_31 = arith.constant dense<0.000000e+00> : vector<8x8xf32>
    %82 = tpu.matmul %81, %65, %cst_31 {dimension_numbers = #tpu.dot_dimension_numbers<[1], [0], [0], [1], [0, 0, 1, 1], [], []>} : vector<8x8xf32>, vector<8x8xf32>, vector<8x8xf32> -> vector<8x8xf32>
    %83 = vector.extract_strided_slice %40 {offsets = [0, 16], sizes = [8, 8], strides = [1, 1]} : vector<8x32xf32> to vector<8x8xf32>
    %84 = vector.extract_strided_slice %41 {offsets = [0, 16], sizes = [8, 8], strides = [1, 1]} : vector<8x32xf32> to vector<8x8xf32>
    %85 = vector.extract_strided_slice %42 {offsets = [0, 16], sizes = [8, 8], strides = [1, 1]} : vector<8x32xf32> to vector<8x8xf32>
    %86 = tpu.transpose %84, [1, 0] : vector<8x8xf32> -> vector<8x8xf32>
    %cst_32 = arith.constant dense<0.000000e+00> : vector<8x8xf32>
    %87 = tpu.matmul %83, %86, %cst_32 {dimension_numbers = #tpu.dot_dimension_numbers<[1], [0], [0], [1], [0, 0, 1, 1], [], []>} : vector<8x8xf32>, vector<8x8xf32>, vector<8x8xf32> -> vector<8x8xf32>
    %cst_33 = arith.constant 0.353553385 : f32
    %88 = vector.broadcast %cst_33 : f32 to vector<8x8xf32>
    %89 = arith.mulf %87, %88 : vector<8x8xf32>
    %90 = vector.broadcast %7 : vector<1x8xf32> to vector<8x8xf32>
    %91 = arith.addf %89, %90 : vector<8x8xf32>
    %cst_34 = arith.constant dense<0xFF800000> : vector<8xf32>
    %92 = vector.multi_reduction <maximumf>, %91, %cst_34 [1] : vector<8x8xf32> to vector<8xf32>
    %93 = vector.shape_cast %92 : vector<8xf32> to vector<8x1xf32>
    %94 = vector.broadcast %93 : vector<8x1xf32> to vector<8x8xf32>
    %95 = arith.subf %91, %94 : vector<8x8xf32>
    %96 = math.exp %95 : vector<8x8xf32>
    %cst_35 = arith.constant dense<0.000000e+00> : vector<8xf32>
    %97 = vector.multi_reduction <add>, %96, %cst_35 [1] : vector<8x8xf32> to vector<8xf32>
    %98 = vector.shape_cast %97 : vector<8xf32> to vector<8x1xf32>
    %99 = tpu.reciprocal %98 {approx = true} : vector<8x1xf32> -> vector<8x1xf32>
    %100 = vector.broadcast %99 : vector<8x1xf32> to vector<8x8xf32>
    %101 = arith.mulf %96, %100 : vector<8x8xf32>
    %cst_36 = arith.constant dense<0.000000e+00> : vector<8x8xf32>
    %102 = tpu.matmul %101, %85, %cst_36 {dimension_numbers = #tpu.dot_dimension_numbers<[1], [0], [0], [1], [0, 0, 1, 1], [], []>} : vector<8x8xf32>, vector<8x8xf32>, vector<8x8xf32> -> vector<8x8xf32>
    %103 = vector.extract_strided_slice %40 {offsets = [0, 24], sizes = [8, 8], strides = [1, 1]} : vector<8x32xf32> to vector<8x8xf32>
    %104 = vector.extract_strided_slice %41 {offsets = [0, 24], sizes = [8, 8], strides = [1, 1]} : vector<8x32xf32> to vector<8x8xf32>
    %105 = vector.extract_strided_slice %42 {offsets = [0, 24], sizes = [8, 8], strides = [1, 1]} : vector<8x32xf32> to vector<8x8xf32>
    %106 = tpu.transpose %104, [1, 0] : vector<8x8xf32> -> vector<8x8xf32>
    %cst_37 = arith.constant dense<0.000000e+00> : vector<8x8xf32>
    %107 = tpu.matmul %103, %106, %cst_37 {dimension_numbers = #tpu.dot_dimension_numbers<[1], [0], [0], [1], [0, 0, 1, 1], [], []>} : vector<8x8xf32>, vector<8x8xf32>, vector<8x8xf32> -> vector<8x8xf32>
    %cst_38 = arith.constant 0.353553385 : f32
    %108 = vector.broadcast %cst_38 : f32 to vector<8x8xf32>
    %109 = arith.mulf %107, %108 : vector<8x8xf32>
    %110 = vector.broadcast %7 : vector<1x8xf32> to vector<8x8xf32>
    %111 = arith.addf %109, %110 : vector<8x8xf32>
    %cst_39 = arith.constant dense<0xFF800000> : vector<8xf32>
    %112 = vector.multi_reduction <maximumf>, %111, %cst_39 [1] : vector<8x8xf32> to vector<8xf32>
    %113 = vector.shape_cast %112 : vector<8xf32> to vector<8x1xf32>
    %114 = vector.broadcast %113 : vector<8x1xf32> to vector<8x8xf32>
    %115 = arith.subf %111, %114 : vector<8x8xf32>
    %116 = math.exp %115 : vector<8x8xf32>
    %cst_40 = arith.constant dense<0.000000e+00> : vector<8xf32>
    %117 = vector.multi_reduction <add>, %116, %cst_40 [1] : vector<8x8xf32> to vector<8xf32>
    %118 = vector.shape_cast %117 : vector<8xf32> to vector<8x1xf32>
    %119 = tpu.reciprocal %118 {approx = true} : vector<8x1xf32> -> vector<8x1xf32>
    %120 = vector.broadcast %119 : vector<8x1xf32> to vector<8x8xf32>
    %121 = arith.mulf %116, %120 : vector<8x8xf32>
    %cst_41 = arith.constant dense<0.000000e+00> : vector<8x8xf32>
    %122 = tpu.matmul %121, %105, %cst_41 {dimension_numbers = #tpu.dot_dimension_numbers<[1], [0], [0], [1], [0, 0, 1, 1], [], []>} : vector<8x8xf32>, vector<8x8xf32>, vector<8x8xf32> -> vector<8x8xf32>
    %123 = tpu.concatenate %62, %82, %102, %122 in 1 : vector<8x8xf32>, vector<8x8xf32>, vector<8x8xf32>, vector<8x8xf32> -> vector<8x32xf32>
    %124 = arith.truncf %123 : vector<8x32xf32> to vector<8x32xbf16>
    %c0_42 = arith.constant 0 : index
    %c0_43 = arith.constant 0 : index
    %c0_44 = arith.constant 0 : index
    %125 = vector.load %arg7[%c0_42, %c0_43, %c0_44] : memref<2x32x32xbf16, #tpu.memory_space<vmem>>, vector<1x32x32xbf16>
    %126 = vector.shape_cast %125 : vector<1x32x32xbf16> to vector<32x32xbf16>
    %cst_45 = arith.constant dense<0.000000e+00> : vector<8x32xf32>
    %127 = tpu.matmul %124, %126, %cst_45 {dimension_numbers = #tpu.dot_dimension_numbers<[1], [0], [0], [1], [0, 0, 1, 1], [], []>} : vector<8x32xbf16>, vector<32x32xbf16>, vector<8x32xf32> -> vector<8x32xf32>
    %c0_46 = arith.constant 0 : index
    %c0_47 = arith.constant 0 : index
    %c0_48 = arith.constant 0 : index
    %128 = vector.load %arg8[%c0_46, %c0_47, %c0_48] : memref<2x1x32xf32, #tpu.memory_space<vmem>>, vector<1x1x32xf32>
    %129 = vector.shape_cast %128 : vector<1x1x32xf32> to vector<1x32xf32>
    %130 = vector.broadcast %129 : vector<1x32xf32> to vector<8x32xf32>
    %131 = arith.addf %127, %130 : vector<8x32xf32>
    %132 = arith.addf %131, %31 : vector<8x32xf32>
    %c0_49 = arith.constant 0 : index
    %c0_50 = arith.constant 0 : index
    %c0_51 = arith.constant 0 : index
    %133 = vector.load %arg9[%c0_49, %c0_50, %c0_51] : memref<2x1x32xf32, #tpu.memory_space<vmem>>, vector<1x1x32xf32>
    %134 = vector.shape_cast %133 : vector<1x1x32xf32> to vector<1x32xf32>
    %c0_52 = arith.constant 0 : index
    %c0_53 = arith.constant 0 : index
    %c0_54 = arith.constant 0 : index
    %135 = vector.load %arg10[%c0_52, %c0_53, %c0_54] : memref<2x1x32xf32, #tpu.memory_space<vmem>>, vector<1x1x32xf32>
    %136 = vector.shape_cast %135 : vector<1x1x32xf32> to vector<1x32xf32>
    %cst_55 = arith.constant dense<0.000000e+00> : vector<8xf32>
    %137 = vector.multi_reduction <add>, %132, %cst_55 [1] : vector<8x32xf32> to vector<8xf32>
    %138 = vector.shape_cast %137 : vector<8xf32> to vector<8x1xf32>
    %cst_56 = arith.constant 3.200000e+01 : f32
    %139 = vector.broadcast %cst_56 : f32 to vector<8x1xf32>
    %140 = arith.divf %138, %139 : vector<8x1xf32>
    %141 = vector.broadcast %140 : vector<8x1xf32> to vector<8x32xf32>
    %142 = arith.subf %132, %141 : vector<8x32xf32>
    %143 = arith.mulf %142, %142 : vector<8x32xf32>
    %cst_57 = arith.constant dense<0.000000e+00> : vector<8xf32>
    %144 = vector.multi_reduction <add>, %143, %cst_57 [1] : vector<8x32xf32> to vector<8xf32>
    %145 = vector.shape_cast %144 : vector<8xf32> to vector<8x1xf32>
    %cst_58 = arith.constant 3.200000e+01 : f32
    %146 = vector.broadcast %cst_58 : f32 to vector<8x1xf32>
    %147 = arith.divf %145, %146 : vector<8x1xf32>
    %148 = vector.broadcast %140 : vector<8x1xf32> to vector<8x32xf32>
    %149 = arith.subf %132, %148 : vector<8x32xf32>
    %cst_59 = arith.constant 9.99999974E-6 : f32
    %150 = vector.broadcast %cst_59 : f32 to vector<8x1xf32>
    %151 = arith.addf %147, %150 : vector<8x1xf32>
    %152 = math.rsqrt %151 : vector<8x1xf32>
    %153 = vector.broadcast %152 : vector<8x1xf32> to vector<8x32xf32>
    %154 = arith.mulf %149, %153 : vector<8x32xf32>
    %155 = vector.broadcast %134 : vector<1x32xf32> to vector<8x32xf32>
    %156 = arith.mulf %154, %155 : vector<8x32xf32>
    %157 = vector.broadcast %136 : vector<1x32xf32> to vector<8x32xf32>
    %158 = arith.addf %156, %157 : vector<8x32xf32>
    %159 = arith.truncf %158 : vector<8x32xf32> to vector<8x32xbf16>
    %c0_60 = arith.constant 0 : index
    %c0_61 = arith.constant 0 : index
    %c0_62 = arith.constant 0 : index
    %160 = vector.load %arg11[%c0_60, %c0_61, %c0_62] : memref<2x32x64xbf16, #tpu.memory_space<vmem>>, vector<1x32x64xbf16>
    %161 = vector.shape_cast %160 : vector<1x32x64xbf16> to vector<32x64xbf16>
    %cst_63 = arith.constant dense<0.000000e+00> : vector<8x64xf32>
    %162 = tpu.matmul %159, %161, %cst_63 {dimension_numbers = #tpu.dot_dimension_numbers<[1], [0], [0], [1], [0, 0, 1, 1], [], []>} : vector<8x32xbf16>, vector<32x64xbf16>, vector<8x64xf32> -> vector<8x64xf32>
    %c0_64 = arith.constant 0 : index
    %c0_65 = arith.constant 0 : index
    %c0_66 = arith.constant 0 : index
    %163 = vector.load %arg12[%c0_64, %c0_65, %c0_66] : memref<2x1x64xf32, #tpu.memory_space<vmem>>, vector<1x1x64xf32>
    %164 = vector.shape_cast %163 : vector<1x1x64xf32> to vector<1x64xf32>
    %165 = vector.broadcast %164 : vector<1x64xf32> to vector<8x64xf32>
    %166 = arith.addf %162, %165 : vector<8x64xf32>
    %167 = arith.mulf %166, %166 : vector<8x64xf32>
    %168 = arith.mulf %166, %167 : vector<8x64xf32>
    %cst_67 = arith.constant 4.471500e-02 : f32
    %169 = vector.broadcast %cst_67 : f32 to vector<8x64xf32>
    %170 = arith.mulf %169, %168 : vector<8x64xf32>
    %171 = arith.addf %166, %170 : vector<8x64xf32>
    %cst_68 = arith.constant 0.797884583 : f32
    %172 = vector.broadcast %cst_68 : f32 to vector<8x64xf32>
    %173 = arith.mulf %172, %171 : vector<8x64xf32>
    %174 = math.tanh %173 : vector<8x64xf32>
    %cst_69 = arith.constant 1.000000e+00 : f32
    %175 = vector.broadcast %cst_69 : f32 to vector<8x64xf32>
    %176 = arith.addf %175, %174 : vector<8x64xf32>
    %cst_70 = arith.constant 5.000000e-01 : f32
    %177 = vector.broadcast %cst_70 : f32 to vector<8x64xf32>
    %178 = arith.mulf %177, %176 : vector<8x64xf32>
    %179 = arith.mulf %166, %178 : vector<8x64xf32>
    %180 = arith.truncf %179 : vector<8x64xf32> to vector<8x64xbf16>
    %c0_71 = arith.constant 0 : index
    %c0_72 = arith.constant 0 : index
    %c0_73 = arith.constant 0 : index
    %181 = vector.load %arg13[%c0_71, %c0_72, %c0_73] : memref<2x64x32xbf16, #tpu.memory_space<vmem>>, vector<1x64x32xbf16>
    %182 = vector.shape_cast %181 : vector<1x64x32xbf16> to vector<64x32xbf16>
    %cst_74 = arith.constant dense<0.000000e+00> : vector<8x32xf32>
    %183 = tpu.matmul %180, %182, %cst_74 {dimension_numbers = #tpu.dot_dimension_numbers<[1], [0], [0], [1], [0, 0, 1, 1], [], []>} : vector<8x64xbf16>, vector<64x32xbf16>, vector<8x32xf32> -> vector<8x32xf32>
    %c0_75 = arith.constant 0 : index
    %c0_76 = arith.constant 0 : index
    %c0_77 = arith.constant 0 : index
    %184 = vector.load %arg14[%c0_75, %c0_76, %c0_77] : memref<2x1x32xf32, #tpu.memory_space<vmem>>, vector<1x1x32xf32>
    %185 = vector.shape_cast %184 : vector<1x1x32xf32> to vector<1x32xf32>
    %186 = vector.broadcast %185 : vector<1x32xf32> to vector<8x32xf32>
    %187 = arith.addf %183, %186 : vector<8x32xf32>
    %188 = arith.addf %187, %158 : vector<8x32xf32>
    %c0_78 = arith.constant 0 : index
    %c0_79 = arith.constant 0 : index
    %c0_80 = arith.constant 0 : index
    %189 = vector.load %arg15[%c0_78, %c0_79, %c0_80] : memref<2x1x32xf32, #tpu.memory_space<vmem>>, vector<1x1x32xf32>
    %190 = vector.shape_cast %189 : vector<1x1x32xf32> to vector<1x32xf32>
    %c0_81 = arith.constant 0 : index
    %c0_82 = arith.constant 0 : index
    %c0_83 = arith.constant 0 : index
    %191 = vector.load %arg16[%c0_81, %c0_82, %c0_83] : memref<2x1x32xf32, #tpu.memory_space<vmem>>, vector<1x1x32xf32>
    %192 = vector.shape_cast %191 : vector<1x1x32xf32> to vector<1x32xf32>
    %cst_84 = arith.constant dense<0.000000e+00> : vector<8xf32>
    %193 = vector.multi_reduction <add>, %188, %cst_84 [1] : vector<8x32xf32> to vector<8xf32>
    %194 = vector.shape_cast %193 : vector<8xf32> to vector<8x1xf32>
    %cst_85 = arith.constant 3.200000e+01 : f32
    %195 = vector.broadcast %cst_85 : f32 to vector<8x1xf32>
    %196 = arith.divf %194, %195 : vector<8x1xf32>
    %197 = vector.broadcast %196 : vector<8x1xf32> to vector<8x32xf32>
    %198 = arith.subf %188, %197 : vector<8x32xf32>
    %199 = arith.mulf %198, %198 : vector<8x32xf32>
    %cst_86 = arith.constant dense<0.000000e+00> : vector<8xf32>
    %200 = vector.multi_reduction <add>, %199, %cst_86 [1] : vector<8x32xf32> to vector<8xf32>
    %201 = vector.shape_cast %200 : vector<8xf32> to vector<8x1xf32>
    %cst_87 = arith.constant 3.200000e+01 : f32
    %202 = vector.broadcast %cst_87 : f32 to vector<8x1xf32>
    %203 = arith.divf %201, %202 : vector<8x1xf32>
    %204 = vector.broadcast %196 : vector<8x1xf32> to vector<8x32xf32>
    %205 = arith.subf %188, %204 : vector<8x32xf32>
    %cst_88 = arith.constant 9.99999974E-6 : f32
    %206 = vector.broadcast %cst_88 : f32 to vector<8x1xf32>
    %207 = arith.addf %203, %206 : vector<8x1xf32>
    %208 = math.rsqrt %207 : vector<8x1xf32>
    %209 = vector.broadcast %208 : vector<8x1xf32> to vector<8x32xf32>
    %210 = arith.mulf %205, %209 : vector<8x32xf32>
    %211 = vector.broadcast %190 : vector<1x32xf32> to vector<8x32xf32>
    %212 = arith.mulf %210, %211 : vector<8x32xf32>
    %213 = vector.broadcast %192 : vector<1x32xf32> to vector<8x32xf32>
    %214 = arith.addf %212, %213 : vector<8x32xf32>
    %215 = arith.truncf %214 : vector<8x32xf32> to vector<8x32xbf16>
    %c1 = arith.constant 1 : index
    %c0_89 = arith.constant 0 : index
    %c0_90 = arith.constant 0 : index
    %216 = vector.load %arg5[%c1, %c0_89, %c0_90] : memref<2x32x96xbf16, #tpu.memory_space<vmem>>, vector<1x32x96xbf16>
    %217 = vector.shape_cast %216 : vector<1x32x96xbf16> to vector<32x96xbf16>
    %cst_91 = arith.constant dense<0.000000e+00> : vector<8x96xf32>
    %218 = tpu.matmul %215, %217, %cst_91 {dimension_numbers = #tpu.dot_dimension_numbers<[1], [0], [0], [1], [0, 0, 1, 1], [], []>} : vector<8x32xbf16>, vector<32x96xbf16>, vector<8x96xf32> -> vector<8x96xf32>
    %c1_92 = arith.constant 1 : index
    %c0_93 = arith.constant 0 : index
    %c0_94 = arith.constant 0 : index
    %219 = vector.load %arg6[%c1_92, %c0_93, %c0_94] : memref<2x1x96xf32, #tpu.memory_space<vmem>>, vector<1x1x96xf32>
    %220 = vector.shape_cast %219 : vector<1x1x96xf32> to vector<1x96xf32>
    %221 = vector.broadcast %220 : vector<1x96xf32> to vector<8x96xf32>
    %222 = arith.addf %218, %221 : vector<8x96xf32>
    %223 = vector.extract_strided_slice %222 {offsets = [0, 0], sizes = [8, 32], strides = [1, 1]} : vector<8x96xf32> to vector<8x32xf32>
    %224 = vector.extract_strided_slice %222 {offsets = [0, 32], sizes = [8, 32], strides = [1, 1]} : vector<8x96xf32> to vector<8x32xf32>
    %225 = vector.extract_strided_slice %222 {offsets = [0, 64], sizes = [8, 32], strides = [1, 1]} : vector<8x96xf32> to vector<8x32xf32>
    %226 = vector.extract_strided_slice %223 {offsets = [0, 0], sizes = [8, 8], strides = [1, 1]} : vector<8x32xf32> to vector<8x8xf32>
    %227 = vector.extract_strided_slice %224 {offsets = [0, 0], sizes = [8, 8], strides = [1, 1]} : vector<8x32xf32> to vector<8x8xf32>
    %228 = vector.extract_strided_slice %225 {offsets = [0, 0], sizes = [8, 8], strides = [1, 1]} : vector<8x32xf32> to vector<8x8xf32>
    %229 = tpu.transpose %227, [1, 0] : vector<8x8xf32> -> vector<8x8xf32>
    %cst_95 = arith.constant dense<0.000000e+00> : vector<8x8xf32>
    %230 = tpu.matmul %226, %229, %cst_95 {dimension_numbers = #tpu.dot_dimension_numbers<[1], [0], [0], [1], [0, 0, 1, 1], [], []>} : vector<8x8xf32>, vector<8x8xf32>, vector<8x8xf32> -> vector<8x8xf32>
    %cst_96 = arith.constant 0.353553385 : f32
    %231 = vector.broadcast %cst_96 : f32 to vector<8x8xf32>
    %232 = arith.mulf %230, %231 : vector<8x8xf32>
    %233 = vector.broadcast %7 : vector<1x8xf32> to vector<8x8xf32>
    %234 = arith.addf %232, %233 : vector<8x8xf32>
    %cst_97 = arith.constant dense<0xFF800000> : vector<8xf32>
    %235 = vector.multi_reduction <maximumf>, %234, %cst_97 [1] : vector<8x8xf32> to vector<8xf32>
    %236 = vector.shape_cast %235 : vector<8xf32> to vector<8x1xf32>
    %237 = vector.broadcast %236 : vector<8x1xf32> to vector<8x8xf32>
    %238 = arith.subf %234, %237 : vector<8x8xf32>
    %239 = math.exp %238 : vector<8x8xf32>
    %cst_98 = arith.constant dense<0.000000e+00> : vector<8xf32>
    %240 = vector.multi_reduction <add>, %239, %cst_98 [1] : vector<8x8xf32> to vector<8xf32>
    %241 = vector.shape_cast %240 : vector<8xf32> to vector<8x1xf32>
    %242 = tpu.reciprocal %241 {approx = true} : vector<8x1xf32> -> vector<8x1xf32>
    %243 = vector.broadcast %242 : vector<8x1xf32> to vector<8x8xf32>
    %244 = arith.mulf %239, %243 : vector<8x8xf32>
    %cst_99 = arith.constant dense<0.000000e+00> : vector<8x8xf32>
    %245 = tpu.matmul %244, %228, %cst_99 {dimension_numbers = #tpu.dot_dimension_numbers<[1], [0], [0], [1], [0, 0, 1, 1], [], []>} : vector<8x8xf32>, vector<8x8xf32>, vector<8x8xf32> -> vector<8x8xf32>
    %246 = vector.extract_strided_slice %223 {offsets = [0, 8], sizes = [8, 8], strides = [1, 1]} : vector<8x32xf32> to vector<8x8xf32>
    %247 = vector.extract_strided_slice %224 {offsets = [0, 8], sizes = [8, 8], strides = [1, 1]} : vector<8x32xf32> to vector<8x8xf32>
    %248 = vector.extract_strided_slice %225 {offsets = [0, 8], sizes = [8, 8], strides = [1, 1]} : vector<8x32xf32> to vector<8x8xf32>
    %249 = tpu.transpose %247, [1, 0] : vector<8x8xf32> -> vector<8x8xf32>
    %cst_100 = arith.constant dense<0.000000e+00> : vector<8x8xf32>
    %250 = tpu.matmul %246, %249, %cst_100 {dimension_numbers = #tpu.dot_dimension_numbers<[1], [0], [0], [1], [0, 0, 1, 1], [], []>} : vector<8x8xf32>, vector<8x8xf32>, vector<8x8xf32> -> vector<8x8xf32>
    %cst_101 = arith.constant 0.353553385 : f32
    %251 = vector.broadcast %cst_101 : f32 to vector<8x8xf32>
    %252 = arith.mulf %250, %251 : vector<8x8xf32>
    %253 = vector.broadcast %7 : vector<1x8xf32> to vector<8x8xf32>
    %254 = arith.addf %252, %253 : vector<8x8xf32>
    %cst_102 = arith.constant dense<0xFF800000> : vector<8xf32>
    %255 = vector.multi_reduction <maximumf>, %254, %cst_102 [1] : vector<8x8xf32> to vector<8xf32>
    %256 = vector.shape_cast %255 : vector<8xf32> to vector<8x1xf32>
    %257 = vector.broadcast %256 : vector<8x1xf32> to vector<8x8xf32>
    %258 = arith.subf %254, %257 : vector<8x8xf32>
    %259 = math.exp %258 : vector<8x8xf32>
    %cst_103 = arith.constant dense<0.000000e+00> : vector<8xf32>
    %260 = vector.multi_reduction <add>, %259, %cst_103 [1] : vector<8x8xf32> to vector<8xf32>
    %261 = vector.shape_cast %260 : vector<8xf32> to vector<8x1xf32>
    %262 = tpu.reciprocal %261 {approx = true} : vector<8x1xf32> -> vector<8x1xf32>
    %263 = vector.broadcast %262 : vector<8x1xf32> to vector<8x8xf32>
    %264 = arith.mulf %259, %263 : vector<8x8xf32>
    %cst_104 = arith.constant dense<0.000000e+00> : vector<8x8xf32>
    %265 = tpu.matmul %264, %248, %cst_104 {dimension_numbers = #tpu.dot_dimension_numbers<[1], [0], [0], [1], [0, 0, 1, 1], [], []>} : vector<8x8xf32>, vector<8x8xf32>, vector<8x8xf32> -> vector<8x8xf32>
    %266 = vector.extract_strided_slice %223 {offsets = [0, 16], sizes = [8, 8], strides = [1, 1]} : vector<8x32xf32> to vector<8x8xf32>
    %267 = vector.extract_strided_slice %224 {offsets = [0, 16], sizes = [8, 8], strides = [1, 1]} : vector<8x32xf32> to vector<8x8xf32>
    %268 = vector.extract_strided_slice %225 {offsets = [0, 16], sizes = [8, 8], strides = [1, 1]} : vector<8x32xf32> to vector<8x8xf32>
    %269 = tpu.transpose %267, [1, 0] : vector<8x8xf32> -> vector<8x8xf32>
    %cst_105 = arith.constant dense<0.000000e+00> : vector<8x8xf32>
    %270 = tpu.matmul %266, %269, %cst_105 {dimension_numbers = #tpu.dot_dimension_numbers<[1], [0], [0], [1], [0, 0, 1, 1], [], []>} : vector<8x8xf32>, vector<8x8xf32>, vector<8x8xf32> -> vector<8x8xf32>
    %cst_106 = arith.constant 0.353553385 : f32
    %271 = vector.broadcast %cst_106 : f32 to vector<8x8xf32>
    %272 = arith.mulf %270, %271 : vector<8x8xf32>
    %273 = vector.broadcast %7 : vector<1x8xf32> to vector<8x8xf32>
    %274 = arith.addf %272, %273 : vector<8x8xf32>
    %cst_107 = arith.constant dense<0xFF800000> : vector<8xf32>
    %275 = vector.multi_reduction <maximumf>, %274, %cst_107 [1] : vector<8x8xf32> to vector<8xf32>
    %276 = vector.shape_cast %275 : vector<8xf32> to vector<8x1xf32>
    %277 = vector.broadcast %276 : vector<8x1xf32> to vector<8x8xf32>
    %278 = arith.subf %274, %277 : vector<8x8xf32>
    %279 = math.exp %278 : vector<8x8xf32>
    %cst_108 = arith.constant dense<0.000000e+00> : vector<8xf32>
    %280 = vector.multi_reduction <add>, %279, %cst_108 [1] : vector<8x8xf32> to vector<8xf32>
    %281 = vector.shape_cast %280 : vector<8xf32> to vector<8x1xf32>
    %282 = tpu.reciprocal %281 {approx = true} : vector<8x1xf32> -> vector<8x1xf32>
    %283 = vector.broadcast %282 : vector<8x1xf32> to vector<8x8xf32>
    %284 = arith.mulf %279, %283 : vector<8x8xf32>
    %cst_109 = arith.constant dense<0.000000e+00> : vector<8x8xf32>
    %285 = tpu.matmul %284, %268, %cst_109 {dimension_numbers = #tpu.dot_dimension_numbers<[1], [0], [0], [1], [0, 0, 1, 1], [], []>} : vector<8x8xf32>, vector<8x8xf32>, vector<8x8xf32> -> vector<8x8xf32>
    %286 = vector.extract_strided_slice %223 {offsets = [0, 24], sizes = [8, 8], strides = [1, 1]} : vector<8x32xf32> to vector<8x8xf32>
    %287 = vector.extract_strided_slice %224 {offsets = [0, 24], sizes = [8, 8], strides = [1, 1]} : vector<8x32xf32> to vector<8x8xf32>
    %288 = vector.extract_strided_slice %225 {offsets = [0, 24], sizes = [8, 8], strides = [1, 1]} : vector<8x32xf32> to vector<8x8xf32>
    %289 = tpu.transpose %287, [1, 0] : vector<8x8xf32> -> vector<8x8xf32>
    %cst_110 = arith.constant dense<0.000000e+00> : vector<8x8xf32>
    %290 = tpu.matmul %286, %289, %cst_110 {dimension_numbers = #tpu.dot_dimension_numbers<[1], [0], [0], [1], [0, 0, 1, 1], [], []>} : vector<8x8xf32>, vector<8x8xf32>, vector<8x8xf32> -> vector<8x8xf32>
    %cst_111 = arith.constant 0.353553385 : f32
    %291 = vector.broadcast %cst_111 : f32 to vector<8x8xf32>
    %292 = arith.mulf %290, %291 : vector<8x8xf32>
    %293 = vector.broadcast %7 : vector<1x8xf32> to vector<8x8xf32>
    %294 = arith.addf %292, %293 : vector<8x8xf32>
    %cst_112 = arith.constant dense<0xFF800000> : vector<8xf32>
    %295 = vector.multi_reduction <maximumf>, %294, %cst_112 [1] : vector<8x8xf32> to vector<8xf32>
    %296 = vector.shape_cast %295 : vector<8xf32> to vector<8x1xf32>
    %297 = vector.broadcast %296 : vector<8x1xf32> to vector<8x8xf32>
    %298 = arith.subf %294, %297 : vector<8x8xf32>
    %299 = math.exp %298 : vector<8x8xf32>
    %cst_113 = arith.constant dense<0.000000e+00> : vector<8xf32>
    %300 = vector.multi_reduction <add>, %299, %cst_113 [1] : vector<8x8xf32> to vector<8xf32>
    %301 = vector.shape_cast %300 : vector<8xf32> to vector<8x1xf32>
    %302 = tpu.reciprocal %301 {approx = true} : vector<8x1xf32> -> vector<8x1xf32>
    %303 = vector.broadcast %302 : vector<8x1xf32> to vector<8x8xf32>
    %304 = arith.mulf %299, %303 : vector<8x8xf32>
    %cst_114 = arith.constant dense<0.000000e+00> : vector<8x8xf32>
    %305 = tpu.matmul %304, %288, %cst_114 {dimension_numbers = #tpu.dot_dimension_numbers<[1], [0], [0], [1], [0, 0, 1, 1], [], []>} : vector<8x8xf32>, vector<8x8xf32>, vector<8x8xf32> -> vector<8x8xf32>
    %306 = tpu.concatenate %245, %265, %285, %305 in 1 : vector<8x8xf32>, vector<8x8xf32>, vector<8x8xf32>, vector<8x8xf32> -> vector<8x32xf32>
    %307 = arith.truncf %306 : vector<8x32xf32> to vector<8x32xbf16>
    %c1_115 = arith.constant 1 : index
    %c0_116 = arith.constant 0 : index
    %c0_117 = arith.constant 0 : index
    %308 = vector.load %arg7[%c1_115, %c0_116, %c0_117] : memref<2x32x32xbf16, #tpu.memory_space<vmem>>, vector<1x32x32xbf16>
    %309 = vector.shape_cast %308 : vector<1x32x32xbf16> to vector<32x32xbf16>
    %cst_118 = arith.constant dense<0.000000e+00> : vector<8x32xf32>
    %310 = tpu.matmul %307, %309, %cst_118 {dimension_numbers = #tpu.dot_dimension_numbers<[1], [0], [0], [1], [0, 0, 1, 1], [], []>} : vector<8x32xbf16>, vector<32x32xbf16>, vector<8x32xf32> -> vector<8x32xf32>
    %c1_119 = arith.constant 1 : index
    %c0_120 = arith.constant 0 : index
    %c0_121 = arith.constant 0 : index
    %311 = vector.load %arg8[%c1_119, %c0_120, %c0_121] : memref<2x1x32xf32, #tpu.memory_space<vmem>>, vector<1x1x32xf32>
    %312 = vector.shape_cast %311 : vector<1x1x32xf32> to vector<1x32xf32>
    %313 = vector.broadcast %312 : vector<1x32xf32> to vector<8x32xf32>
    %314 = arith.addf %310, %313 : vector<8x32xf32>
    %315 = arith.addf %314, %214 : vector<8x32xf32>
    %c1_122 = arith.constant 1 : index
    %c0_123 = arith.constant 0 : index
    %c0_124 = arith.constant 0 : index
    %316 = vector.load %arg9[%c1_122, %c0_123, %c0_124] : memref<2x1x32xf32, #tpu.memory_space<vmem>>, vector<1x1x32xf32>
    %317 = vector.shape_cast %316 : vector<1x1x32xf32> to vector<1x32xf32>
    %c1_125 = arith.constant 1 : index
    %c0_126 = arith.constant 0 : index
    %c0_127 = arith.constant 0 : index
    %318 = vector.load %arg10[%c1_125, %c0_126, %c0_127] : memref<2x1x32xf32, #tpu.memory_space<vmem>>, vector<1x1x32xf32>
    %319 = vector.shape_cast %318 : vector<1x1x32xf32> to vector<1x32xf32>
    %cst_128 = arith.constant dense<0.000000e+00> : vector<8xf32>
    %320 = vector.multi_reduction <add>, %315, %cst_128 [1] : vector<8x32xf32> to vector<8xf32>
    %321 = vector.shape_cast %320 : vector<8xf32> to vector<8x1xf32>
    %cst_129 = arith.constant 3.200000e+01 : f32
    %322 = vector.broadcast %cst_129 : f32 to vector<8x1xf32>
    %323 = arith.divf %321, %322 : vector<8x1xf32>
    %324 = vector.broadcast %323 : vector<8x1xf32> to vector<8x32xf32>
    %325 = arith.subf %315, %324 : vector<8x32xf32>
    %326 = arith.mulf %325, %325 : vector<8x32xf32>
    %cst_130 = arith.constant dense<0.000000e+00> : vector<8xf32>
    %327 = vector.multi_reduction <add>, %326, %cst_130 [1] : vector<8x32xf32> to vector<8xf32>
    %328 = vector.shape_cast %327 : vector<8xf32> to vector<8x1xf32>
    %cst_131 = arith.constant 3.200000e+01 : f32
    %329 = vector.broadcast %cst_131 : f32 to vector<8x1xf32>
    %330 = arith.divf %328, %329 : vector<8x1xf32>
    %331 = vector.broadcast %323 : vector<8x1xf32> to vector<8x32xf32>
    %332 = arith.subf %315, %331 : vector<8x32xf32>
    %cst_132 = arith.constant 9.99999974E-6 : f32
    %333 = vector.broadcast %cst_132 : f32 to vector<8x1xf32>
    %334 = arith.addf %330, %333 : vector<8x1xf32>
    %335 = math.rsqrt %334 : vector<8x1xf32>
    %336 = vector.broadcast %335 : vector<8x1xf32> to vector<8x32xf32>
    %337 = arith.mulf %332, %336 : vector<8x32xf32>
    %338 = vector.broadcast %317 : vector<1x32xf32> to vector<8x32xf32>
    %339 = arith.mulf %337, %338 : vector<8x32xf32>
    %340 = vector.broadcast %319 : vector<1x32xf32> to vector<8x32xf32>
    %341 = arith.addf %339, %340 : vector<8x32xf32>
    %342 = arith.truncf %341 : vector<8x32xf32> to vector<8x32xbf16>
    %c1_133 = arith.constant 1 : index
    %c0_134 = arith.constant 0 : index
    %c0_135 = arith.constant 0 : index
    %343 = vector.load %arg11[%c1_133, %c0_134, %c0_135] : memref<2x32x64xbf16, #tpu.memory_space<vmem>>, vector<1x32x64xbf16>
    %344 = vector.shape_cast %343 : vector<1x32x64xbf16> to vector<32x64xbf16>
    %cst_136 = arith.constant dense<0.000000e+00> : vector<8x64xf32>
    %345 = tpu.matmul %342, %344, %cst_136 {dimension_numbers = #tpu.dot_dimension_numbers<[1], [0], [0], [1], [0, 0, 1, 1], [], []>} : vector<8x32xbf16>, vector<32x64xbf16>, vector<8x64xf32> -> vector<8x64xf32>
    %c1_137 = arith.constant 1 : index
    %c0_138 = arith.constant 0 : index
    %c0_139 = arith.constant 0 : index
    %346 = vector.load %arg12[%c1_137, %c0_138, %c0_139] : memref<2x1x64xf32, #tpu.memory_space<vmem>>, vector<1x1x64xf32>
    %347 = vector.shape_cast %346 : vector<1x1x64xf32> to vector<1x64xf32>
    %348 = vector.broadcast %347 : vector<1x64xf32> to vector<8x64xf32>
    %349 = arith.addf %345, %348 : vector<8x64xf32>
    %350 = arith.mulf %349, %349 : vector<8x64xf32>
    %351 = arith.mulf %349, %350 : vector<8x64xf32>
    %cst_140 = arith.constant 4.471500e-02 : f32
    %352 = vector.broadcast %cst_140 : f32 to vector<8x64xf32>
    %353 = arith.mulf %352, %351 : vector<8x64xf32>
    %354 = arith.addf %349, %353 : vector<8x64xf32>
    %cst_141 = arith.constant 0.797884583 : f32
    %355 = vector.broadcast %cst_141 : f32 to vector<8x64xf32>
    %356 = arith.mulf %355, %354 : vector<8x64xf32>
    %357 = math.tanh %356 : vector<8x64xf32>
    %cst_142 = arith.constant 1.000000e+00 : f32
    %358 = vector.broadcast %cst_142 : f32 to vector<8x64xf32>
    %359 = arith.addf %358, %357 : vector<8x64xf32>
    %cst_143 = arith.constant 5.000000e-01 : f32
    %360 = vector.broadcast %cst_143 : f32 to vector<8x64xf32>
    %361 = arith.mulf %360, %359 : vector<8x64xf32>
    %362 = arith.mulf %349, %361 : vector<8x64xf32>
    %363 = arith.truncf %362 : vector<8x64xf32> to vector<8x64xbf16>
    %c1_144 = arith.constant 1 : index
    %c0_145 = arith.constant 0 : index
    %c0_146 = arith.constant 0 : index
    %364 = vector.load %arg13[%c1_144, %c0_145, %c0_146] : memref<2x64x32xbf16, #tpu.memory_space<vmem>>, vector<1x64x32xbf16>
    %365 = vector.shape_cast %364 : vector<1x64x32xbf16> to vector<64x32xbf16>
    %cst_147 = arith.constant dense<0.000000e+00> : vector<8x32xf32>
    %366 = tpu.matmul %363, %365, %cst_147 {dimension_numbers = #tpu.dot_dimension_numbers<[1], [0], [0], [1], [0, 0, 1, 1], [], []>} : vector<8x64xbf16>, vector<64x32xbf16>, vector<8x32xf32> -> vector<8x32xf32>
    %c1_148 = arith.constant 1 : index
    %c0_149 = arith.constant 0 : index
    %c0_150 = arith.constant 0 : index
    %367 = vector.load %arg14[%c1_148, %c0_149, %c0_150] : memref<2x1x32xf32, #tpu.memory_space<vmem>>, vector<1x1x32xf32>
    %368 = vector.shape_cast %367 : vector<1x1x32xf32> to vector<1x32xf32>
    %369 = vector.broadcast %368 : vector<1x32xf32> to vector<8x32xf32>
    %370 = arith.addf %366, %369 : vector<8x32xf32>
    %371 = arith.addf %370, %341 : vector<8x32xf32>
    %c1_151 = arith.constant 1 : index
    %c0_152 = arith.constant 0 : index
    %c0_153 = arith.constant 0 : index
    %372 = vector.load %arg15[%c1_151, %c0_152, %c0_153] : memref<2x1x32xf32, #tpu.memory_space<vmem>>, vector<1x1x32xf32>
    %373 = vector.shape_cast %372 : vector<1x1x32xf32> to vector<1x32xf32>
    %c1_154 = arith.constant 1 : index
    %c0_155 = arith.constant 0 : index
    %c0_156 = arith.constant 0 : index
    %374 = vector.load %arg16[%c1_154, %c0_155, %c0_156] : memref<2x1x32xf32, #tpu.memory_space<vmem>>, vector<1x1x32xf32>
    %375 = vector.shape_cast %374 : vector<1x1x32xf32> to vector<1x32xf32>
    %cst_157 = arith.constant dense<0.000000e+00> : vector<8xf32>
    %376 = vector.multi_reduction <add>, %371, %cst_157 [1] : vector<8x32xf32> to vector<8xf32>
    %377 = vector.shape_cast %376 : vector<8xf32> to vector<8x1xf32>
    %cst_158 = arith.constant 3.200000e+01 : f32
    %378 = vector.broadcast %cst_158 : f32 to vector<8x1xf32>
    %379 = arith.divf %377, %378 : vector<8x1xf32>
    %380 = vector.broadcast %379 : vector<8x1xf32> to vector<8x32xf32>
    %381 = arith.subf %371, %380 : vector<8x32xf32>
    %382 = arith.mulf %381, %381 : vector<8x32xf32>
    %cst_159 = arith.constant dense<0.000000e+00> : vector<8xf32>
    %383 = vector.multi_reduction <add>, %382, %cst_159 [1] : vector<8x32xf32> to vector<8xf32>
    %384 = vector.shape_cast %383 : vector<8xf32> to vector<8x1xf32>
    %cst_160 = arith.constant 3.200000e+01 : f32
    %385 = vector.broadcast %cst_160 : f32 to vector<8x1xf32>
    %386 = arith.divf %384, %385 : vector<8x1xf32>
    %387 = vector.broadcast %379 : vector<8x1xf32> to vector<8x32xf32>
    %388 = arith.subf %371, %387 : vector<8x32xf32>
    %cst_161 = arith.constant 9.99999974E-6 : f32
    %389 = vector.broadcast %cst_161 : f32 to vector<8x1xf32>
    %390 = arith.addf %386, %389 : vector<8x1xf32>
    %391 = math.rsqrt %390 : vector<8x1xf32>
    %392 = vector.broadcast %391 : vector<8x1xf32> to vector<8x32xf32>
    %393 = arith.mulf %388, %392 : vector<8x32xf32>
    %394 = vector.broadcast %373 : vector<1x32xf32> to vector<8x32xf32>
    %395 = arith.mulf %393, %394 : vector<8x32xf32>
    %396 = vector.broadcast %375 : vector<1x32xf32> to vector<8x32xf32>
    %397 = arith.addf %395, %396 : vector<8x32xf32>
    %398 = vector.extract_strided_slice %397 {offsets = [0, 0], sizes = [1, 32], strides = [1, 1]} : vector<8x32xf32> to vector<1x32xf32>
    %399 = arith.truncf %398 : vector<1x32xf32> to vector<1x32xbf16>
    %c0_162 = arith.constant 0 : index
    %c0_163 = arith.constant 0 : index
    %400 = vector.load %arg17[%c0_162, %c0_163] : memref<32x32xbf16, #tpu.memory_space<vmem>>, vector<32x32xbf16>
    %cst_164 = arith.constant dense<0.000000e+00> : vector<1x32xf32>
    %401 = tpu.matmul %399, %400, %cst_164 {dimension_numbers = #tpu.dot_dimension_numbers<[1], [0], [0], [1], [0, 0, 1, 1], [], []>} : vector<1x32xbf16>, vector<32x32xbf16>, vector<1x32xf32> -> vector<1x32xf32>
    %c0_165 = arith.constant 0 : index
    %c0_166 = arith.constant 0 : index
    %402 = vector.load %arg18[%c0_165, %c0_166] : memref<1x32xf32, #tpu.memory_space<vmem>>, vector<1x32xf32>
    %403 = arith.addf %401, %402 : vector<1x32xf32>
    %cst_167 = arith.constant 0.000000e+00 : f32
    %404 = vector.broadcast %cst_167 : f32 to vector<1x32xf32>
    %405 = arith.maximumf %403, %404 : vector<1x32xf32>
    %406 = arith.truncf %405 : vector<1x32xf32> to vector<1x32xbf16>
    %c0_168 = arith.constant 0 : index
    %c0_169 = arith.constant 0 : index
    %407 = vector.load %arg19[%c0_168, %c0_169] : memref<32x128xbf16, #tpu.memory_space<vmem>>, vector<32x128xbf16>
    %cst_170 = arith.constant dense<0.000000e+00> : vector<1x128xf32>
    %408 = tpu.matmul %406, %407, %cst_170 {dimension_numbers = #tpu.dot_dimension_numbers<[1], [0], [0], [1], [0, 0, 1, 1], [], []>} : vector<1x32xbf16>, vector<32x128xbf16>, vector<1x128xf32> -> vector<1x128xf32>
    %c0_171 = arith.constant 0 : index
    %c0_172 = arith.constant 0 : index
    %409 = vector.load %arg20[%c0_171, %c0_172] : memref<1x128xf32, #tpu.memory_space<vmem>>, vector<1x128xf32>
    %410 = arith.addf %408, %409 : vector<1x128xf32>
    %c0_173 = arith.constant 0 : index
    %c0_174 = arith.constant 0 : index
    %c0_175 = arith.constant 0 : index
    %411 = vector.load %arg21[%c0_173, %c0_174, %c0_175] : memref<1x1x128xf32, #tpu.memory_space<vmem>>, vector<1x1x128xf32>
    %412 = vector.shape_cast %411 : vector<1x1x128xf32> to vector<1x128xf32>
    %413 = vector.shape_cast %410 : vector<1x128xf32> to vector<1x1x128xf32>
    tpu.vector_store %arg21[%c0_173, %c0_174, %c0_175], %413 {strides = array<i32>} : memref<1x1x128xf32, #tpu.memory_space<vmem>>, vector<1x1x128xf32>,
    return
  }
  func.func @transform_0(%arg0: i32) -> (i32, i32, i32) {
    %c0_i32 = arith.constant 0 : i32
    %c0_i32_0 = arith.constant 0 : i32
    %c0_i32_1 = arith.constant 0 : i32
    return %arg0, %c0_i32, %c0_i32_0 : i32, i32, i32
  }
  func.func @transform_1(%arg0: i32) -> (i32, i32, i32) {
    %c0_i32 = arith.constant 0 : i32
    %c0_i32_0 = arith.constant 0 : i32
    %c0_i32_1 = arith.constant 0 : i32
    return %arg0, %c0_i32, %c0_i32_0 : i32, i32, i32
  }
  func.func @transform_2(%arg0: i32) -> (i32, i32) {
    %c0_i32 = arith.constant 0 : i32
    %c0_i32_0 = arith.constant 0 : i32
    %c0_i32_1 = arith.constant 0 : i32
    return %c0_i32, %c0_i32_0 : i32, i32
  }
  func.func @transform_3(%arg0: i32) -> (i32, i32) {
    %c0_i32 = arith.constant 0 : i32
    %c0_i32_0 = arith.constant 0 : i32
    %c0_i32_1 = arith.constant 0 : i32
    return %c0_i32, %c0_i32_0 : i32, i32
  }
  func.func @transform_4(%arg0: i32) -> (i32, i32, i32) {
    %c0_i32 = arith.constant 0 : i32
    %c0_i32_0 = arith.constant 0 : i32
    %c0_i32_1 = arith.constant 0 : i32
    %c0_i32_2 = arith.constant 0 : i32
    return %c0_i32, %c0_i32_0, %c0_i32_1 : i32, i32, i32
  }
  func.func @transform_5(%arg0: i32) -> (i32, i32, i32) {
    %c0_i32 = arith.constant 0 : i32
    %c0_i32_0 = arith.constant 0 : i32
    %c0_i32_1 = arith.constant 0 : i32
    %c0_i32_2 = arith.constant 0 : i32
    return %c0_i32, %c0_i32_0, %c0_i32_1 : i32, i32, i32
  }
  func.func @transform_6(%arg0: i32) -> (i32, i32, i32) {
    %c0_i32 = arith.constant 0 : i32
    %c0_i32_0 = arith.constant 0 : i32
    %c0_i32_1 = arith.constant 0 : i32
    %c0_i32_2 = arith.constant 0 : i32
    return %c0_i32, %c0_i32_0, %c0_i32_1 : i32, i32, i32
  }
  func.func @transform_7(%arg0: i32) -> (i32, i32, i32) {
    %c0_i32 = arith.constant 0 : i32
    %c0_i32_0 = arith.constant 0 : i32
    %c0_i32_1 = arith.constant 0 : i32
    %c0_i32_2 = arith.constant 0 : i32
    return %c0_i32, %c0_i32_0, %c0_i32_1 : i32, i32, i32
  }
  func.func @transform_8(%arg0: i32) -> (i32, i32, i32) {
    %c0_i32 = arith.constant 0 : i32
    %c0_i32_0 = arith.constant 0 : i32
    %c0_i32_1 = arith.constant 0 : i32
    %c0_i32_2 = arith.constant 0 : i32
    return %c0_i32, %c0_i32_0, %c0_i32_1 : i32, i32, i32
  }
  func.func @transform_9(%arg0: i32) -> (i32, i32, i32) {
    %c0_i32 = arith.constant 0 : i32
    %c0_i32_0 = arith.constant 0 : i32
    %c0_i32_1 = arith.constant 0 : i32
    %c0_i32_2 = arith.constant 0 : i32
    return %c0_i32, %c0_i32_0, %c0_i32_1 : i32, i32, i32
  }
  func.func @transform_10(%arg0: i32) -> (i32, i32, i32) {
    %c0_i32 = arith.constant 0 : i32
    %c0_i32_0 = arith.constant 0 : i32
    %c0_i32_1 = arith.constant 0 : i32
    %c0_i32_2 = arith.constant 0 : i32
    return %c0_i32, %c0_i32_0, %c0_i32_1 : i32, i32, i32
  }
  func.func @transform_11(%arg0: i32) -> (i32, i32, i32) {
    %c0_i32 = arith.constant 0 : i32
    %c0_i32_0 = arith.constant 0 : i32
    %c0_i32_1 = arith.constant 0 : i32
    %c0_i32_2 = arith.constant 0 : i32
    return %c0_i32, %c0_i32_0, %c0_i32_1 : i32, i32, i32
  }
  func.func @transform_12(%arg0: i32) -> (i32, i32, i32) {
    %c0_i32 = arith.constant 0 : i32
    %c0_i32_0 = arith.constant 0 : i32
    %c0_i32_1 = arith.constant 0 : i32
    %c0_i32_2 = arith.constant 0 : i32
    return %c0_i32, %c0_i32_0, %c0_i32_1 : i32, i32, i32
  }
  func.func @transform_13(%arg0: i32) -> (i32, i32, i32) {
    %c0_i32 = arith.constant 0 : i32
    %c0_i32_0 = arith.constant 0 : i32
    %c0_i32_1 = arith.constant 0 : i32
    %c0_i32_2 = arith.constant 0 : i32
    return %c0_i32, %c0_i32_0, %c0_i32_1 : i32, i32, i32
  }
  func.func @transform_14(%arg0: i32) -> (i32, i32, i32) {
    %c0_i32 = arith.constant 0 : i32
    %c0_i32_0 = arith.constant 0 : i32
    %c0_i32_1 = arith.constant 0 : i32
    %c0_i32_2 = arith.constant 0 : i32
    return %c0_i32, %c0_i32_0, %c0_i32_1 : i32, i32, i32
  }
  func.func @transform_15(%arg0: i32) -> (i32, i32, i32) {
    %c0_i32 = arith.constant 0 : i32
    %c0_i32_0 = arith.constant 0 : i32
    %c0_i32_1 = arith.constant 0 : i32
    %c0_i32_2 = arith.constant 0 : i32
    return %c0_i32, %c0_i32_0, %c0_i32_1 : i32, i32, i32
  }
  func.func @transform_16(%arg0: i32) -> (i32, i32) {
    %c0_i32 = arith.constant 0 : i32
    %c0_i32_0 = arith.constant 0 : i32
    %c0_i32_1 = arith.constant 0 : i32
    return %c0_i32, %c0_i32_0 : i32, i32
  }
  func.func @transform_17(%arg0: i32) -> (i32, i32) {
    %c0_i32 = arith.constant 0 : i32
    %c0_i32_0 = arith.constant 0 : i32
    %c0_i32_1 = arith.constant 0 : i32
    return %c0_i32, %c0_i32_0 : i32, i32
  }
  func.func @transform_18(%arg0: i32) -> (i32, i32) {
    %c0_i32 = arith.constant 0 : i32
    %c0_i32_0 = arith.constant 0 : i32
    %c0_i32_1 = arith.constant 0 : i32
    return %c0_i32, %c0_i32_0 : i32, i32
  }
  func.func @transform_19(%arg0: i32) -> (i32, i32) {
    %c0_i32 = arith.constant 0 : i32
    %c0_i32_0 = arith.constant 0 : i32
    %c0_i32_1 = arith.constant 0 : i32
    return %c0_i32, %c0_i32_0 : i32, i32
  }
  func.func @transform_20(%arg0: i32) -> (i32, i32, i32) {
    %c0_i32 = arith.constant 0 : i32
    %c0_i32_0 = arith.constant 0 : i32
    %c0_i32_1 = arith.constant 0 : i32
    return %arg0, %c0_i32, %c0_i32_0 : i32, i32, i32
  }
}

</mosaic_0001>

<bundles_post_ra>
// kernel: roberta_class_forward.1
= control target key start
LH: loop header
LB: loop body
LE: loop exit
PB: predicated region body
PF: predicated region fallthrough
CT: control target
= control target key end

     0   :  { %s4097_s0 = inlined_call_operand.vmem [shape: f32[2,8,32], index: 0, kind: input, shape index: {}]   ;;  %s4098_s1 = inlined_call_operand.vmem [shape: f32[2,1,8], index: 1, kind: input, shape index: {}]   ;;  %s4099_s2 = inlined_call_operand.vmem [shape: f32[1,32], index: 2, kind: input, shape index: {}]   ;;  %s4100_s3 = inlined_call_operand.vmem [shape: f32[1,32], index: 3, kind: input, shape index: {}]   ;;  %s4101_s4 = inlined_call_operand.vmem [shape: bf16[2,32,96], index: 4, kind: input, shape index: {}]   ;;  %s4102_s5 = inlined_call_operand.vmem [shape: f32[2,1,96], index: 5, kind: input, shape index: {}]   ;;  %s4103_s6 = inlined_call_operand.vmem [shape: bf16[2,32,32], index: 6, kind: input, shape index: {}]   ;;  %s4104_s7 = inlined_call_operand.vmem [shape: f32[2,1,32], index: 7, kind: input, shape index: {}]   ;;  %s4105_s8 = inlined_call_operand.vmem [shape: f32[2,1,32], index: 8, kind: input, shape index: {}]   ;;  %s4106_s9 = inlined_call_operand.vmem [shape: f32[2,1,32], index: 9, kind: input, shape index: {}]   ;;  %s4107_s10 = inlined_call_operand.vmem [shape: bf16[2,32,64], index: 10, kind: input, shape index: {}]   ;;  %s4108_s11 = inlined_call_operand.vmem [shape: f32[2,1,64], index: 11, kind: input, shape index: {}]   ;;  %s4109_s12 = inlined_call_operand.vmem [shape: bf16[2,64,32], index: 12, kind: input, shape index: {}]   ;;  %s4110_s13 = inlined_call_operand.vmem [shape: f32[2,1,32], index: 13, kind: input, shape index: {}]   ;;  %s4111_s14 = inlined_call_operand.vmem [shape: f32[2,1,32], index: 14, kind: input, shape index: {}]   ;;  %s4112_s15 = inlined_call_operand.vmem [shape: f32[2,1,32], index: 15, kind: input, shape index: {}]   ;;  %s4113_s16 = inlined_call_operand.vmem [shape: bf16[32,32], index: 16, kind: input, shape index: {}]   ;;  %s4114_s17 = inlined_call_operand.vmem [shape: f32[1,32], index: 17, kind: input, shape index: {}]   ;;  %s4115_s18 = inlined_call_operand.vmem [shape: bf16[32,128], index: 18, kind: input, shape index: {}]   ;;  %s4116_s19 = inlined_call_operand.vmem [shape: f32[1,128], index: 19, kind: input, shape index: {}]   ;;  %s4117_s20 = inlined_call_operand.hbm [shape: f32[2,1,128], index: 20, kind: output, shape index: {}]  }
   0x1   :  { %4136 = sst [smem:[#allocation9_spill]] %s4097_s0 }
   0x2   :  { %4137 = sst [smem:[#allocation10_spill]] %s4098_s1 }
   0x3   :  { %4138 = sst [smem:[#allocation11_spill]] %s4099_s2 }
   0x4   :  { %4139 = sst [smem:[#allocation12_spill]] %s4100_s3 }
   0x5   :  { %4140 = sst [smem:[#allocation13_spill]] %s4101_s4 }
   0x6   :  { %4141 = sst [smem:[#allocation14_spill]] %s4102_s5 }
   0x7   :  { %25 = vsyncpa [#allocation3], 0 }
   0x8   :  { %27 = vsyncpa [#allocation3 + $0x1], 0  ;;  %s3622_s1 = smov 0   ;;  %s3624_s22 = smov 0  }
   0x9   :  { %s3626_s23 = smov 0   ;;  %s3628_s24 = smov 0  }
   0xa LB: > { %4142 = sst [smem:[#allocation5_spill]] %s3494_s23  ;;  %s3643_s2 = sadd.s32 4294967295, %s3498_s24   ;;  %s3498_s24 = sphi %s3628_s24, %s4167_s24   ;;  %s3494_s23 = sphi %s3626_s23, %s4169_s23   ;;  %s3490_s22 = sphi %s3624_s22, %s4171_s22   ;;  %s3486_s1 = sphi %s3622_s1, %s4170_s1  }
   0xb   : > { %s2967_s25 = sadd.s32 4294967294, %s3498_s24   ;;  %s3647_s3 = sadd.s32 1, %s3498_s24  }
   0xc   : > { %4143 = sst [smem:[#allocation6_spill]] %s3647_s3  ;;  %s470_s26 = sadd.s32 1, %s3494_s23 }
   0xd   : > { %s467_s27 = ssub.s32 %s3498_s24, %s3647_s3  ;;  %p480_p0 = scmp.ne.s32.totalorder %s3494_s23, %s3490_s22 }
   0xe   : > { %p468_p1 = scmp.eq.s32.totalorder %s467_s27, 0  ;;  %p481_p2 = scmp.eq.s32.totalorder %s3643_s2, 1 }
   0xf   : > { %p486_p3 = scmp.ne.s32.totalorder %s3490_s22, %s3486_s1  ;;  %p487_p4 = scmp.eq.s32.totalorder %s2967_s25, 1 }
  0x10   : > { %s3658_s28 = scalar_select %p468_p1, %s3494_s23, %s470_s26  }
  0x11   : > { %p3660_p5 = por %p481_p2, %p480_p0  ;;  %p3664_p6 = por %p487_p4, %p486_p3 }
  0x12   : > { %4144 = sst [smem:[#allocation7_spill]] %s3658_s28  ;;  %p2970_p7 = scmp.ge.s32.totalorder %s3498_s24, 1 }
  0x13   : > { %s4146_s29 = scalar_select %p3664_p6, 1, 0 }
  0x14   : > { %p572_p8 = scmp.lt.s32.totalorder %s3498_s24, 3 }
  0x15   : > { %4147 = sst [smem:[#allocation8_spill]] %s4146_s29 }
  0x16   : > { %p573_p9 = pnand %p2970_p7, %p572_p8 }
  0x17   : > { %p631_p10 = scmp.lt.s32.totalorder (!%p573_p9), %s3643_s2, 1  ;;  %s4148_s26 = sld [smem:[#allocation9_spill]] (!%p573_p9) }
  0x18   : > { %576 = sbr.rel (%p573_p9) target bundleno = 6033 (0x1791), region = 100  ;;  %s4149_s3 = sld [smem:[#allocation13_spill]] (!%p573_p9) }
  0x19   : > { %s4150_s25 = sld [smem:[#allocation11_spill]] (!%p573_p9)  ;;  %s4124_s23 = smov (!%p573_p9), 64  }
  0x1a   : > { %s4152_s5 = sld [smem:[#allocation14_spill]] (!%p573_p9)  ;;  %s3503_s28 = smov (!%p573_p9), 96  }
  0x1b   : > { %s4129_s21 = smov (!%p573_p9), 80   ;;  %s4130_s29 = smov (!%p573_p9), 112  }
  0x1d   : > { %s3672_s30 = scalar_select %p631_p10, %s3643_s2, 1  ;;  %vm645_vm0 = vcmask 261120   ;;  %v3500_v8 = vmov 0.0   ;;  %vm3501_vm1 = vmmov 0   ;;  %vm744_vm2 = vcmask 64512  }
  0x1e   : > { %v3368_v7 = vld [vmem:[%s4149_s3 + $0x8] sm:$0xff]   ;;  %3145 = vmatprep.subr.bf16.mxu0 %v3500_v8  ;;  %3149 = vmatprep.mubr.msk.bf16.mxu0 %vm3501_vm1, %v3500_v8  ;;  %v3369_v9 = vld [vmem:[%s4149_s3] sm:$0xff]   ;;  %v821_v28 = vlaneseq  ;;  %vm1428_vm3 = vcmask 130048   ;;  %vm1430_vm4 = vcmask 195584   ;;  %vm1645_vm5 = vcmask 523264  }
  0x1f   : > { %s2971_s0 = sshll.u32 %s3672_s30, 3  ;;  %3146 = vmatpush3.bf16.msra.mxu0 %v3368_v7  ;;  %3153 = vmatprep.subr.mxu1 %v3500_v8  ;;  %v2972_v14 = vld [vmem:[%s4150_s25] ss:$0 sm:$0xff]  ;;  %s3504_s25 = smov 88  }
  0x20   : > { %s634_s27 = scalar_lea.vmem %s4148_s26, %s2971_s0  ;;  %3147 = vmatprep.subr.bf16.mxu0 %v3500_v8  ;;  %3155 = vmatprep.mubr.msk.f32.mxu1 %vm3501_vm1, %v3500_v8  ;;  %s4151_s0 = sld [smem:[#allocation12_spill]]  ;;  %v2974_v20 = vld [vmem:[%s4152_s5] ss:$0 sm:$0xff]  ;;  %v822_v31 = vshrl.u32 %v821_v28, 7 }
  0x21   : > { %v639_v0 = vld [vmem:[%s634_s27] sm:$0xff]  ;;  %s4153_s27 = sld [smem:[#allocation10_spill]]  ;;  %s4127_s26 = smov 72  }
  0x22   : > { %v646_v1 = vsel %vm645_vm0, %v639_v0, 0.0  ;;  %v823_v33 = vsub.s32 0, %v822_v31 }
  0x23   : > { %647 = vadd.xlane.f32.xlu0 %v646_v1  ;;  %3148 = vmatpush3.bf16.msra.mxu0 %v3369_v9 }
  0x24   : > { %3168 = vmatprep.subr.mxu0 %v3500_v8 }
  0x26   : > { %v2973_v16 = vld [vmem:[%s4151_s0] ss:$0 sm:$0xff] }
  0x27   : > { %s637_s0 = scalar_lea.vmem %s4153_s27, %s3672_s30  ;;  %s4134_s30 = smov 120  }
  0x28   : > { %v640_v29 = vld [vmem:[%s637_s0] sm:$0x1]  ;;  %s4128_s27 = smov 104   ;;  %s4123_s0 = smov 48  }
  0x29   : > { %v641_v30 = vsub.f32 1.0, %v640_v29 }
  0x2b   : > { %v642_v32 = vmul.f32 -10000.0, %v641_v30 }
  0x2d   : > { %v3729_v34 = vrot.slane %v642_v32, %v823_v33 }
  0xac   : > { %v648_v2 = vpop.xlane.xlu0 %647 }
  0xad   : > { %v650_v3 = vmul.f32 0.03125, %v648_v2 }
  0xaf   : > { %v651_v4 = vsub.f32 %v639_v0, %v650_v3 }
  0xb1   : > { %v652_v5 = vmul.f32 %v651_v4, %v651_v4 }
  0xb3   : > { %v653_v6 = vsel %vm645_vm0, %v652_v5, 0.0 }
  0xb4   : > { %654 = vadd.xlane.f32.xlu0 %v653_v6 }
 0x13d   : > { %v655_v10 = vpop.xlane.xlu0 %654 }
 0x13e   : > { %v656_v11 = vmul.f32 0.03125, %v655_v10 }
 0x140   : > { %v657_v12 = vadd.f32 1e-05, %v656_v11 }
 0x142   : > { %3392 = vrsqrt.f32 %v657_v12 }
 0x14f   : > { %v3393_v13 = vpop.eup %3392 }
 0x150   : > { %v659_v15 = vmul.f32 %v3393_v13, %v651_v4 }
 0x152   : > { %v666_v17 = vmul.f32 %v2972_v14, %v659_v15 }
 0x154   : > { %v3700_v18 = vadd.f32 %v2973_v16, %v666_v17 }
 0x156   : > { %v674_v19 = vpack.c.bf16 %v3700_v18, %v3700_v18 }
 0x158   : > { %3150 = vmatmul.mubr.msk.bf16.vlgmr.msra.gmra.mxu0 %vm645_vm0, %v674_v19 }
 0x159   : > { %3170 = vmatprep.mubr.msk.f32.mxu0 %vm3501_vm1, %v3500_v8 }
 0x218   : > { %v735_v21 = vpop.f32.mrf.mxu0 }
 0x219   : > { %v3710_v22 = vadd.f32 %v2974_v20, %v735_v21 }
 0x21a   : > { %v3151_v23 = vpop.f32.mrf.mxu0 }
 0x21b   : > { %838 = vrot.lane.b32.xlu0 %v3710_v22, %s4124_s23  ;;  %742 = vrot.lane.b32.xlu1 %v3710_v22, %s3503_s28  ;;  %s4125_s23 = smov 56  }
 0x21c   : > { %v738_v24 = vpop.f32.mrf.mxu0 }
 0x21e   : > { %v3152_v25 = vpop.f32.mrf.mxu0 }
 0x21f   : > { %916 = vrot.lane.b32.xlu0 %v3710_v22, %s3504_s25 }
 0x28d   : > { %v743_v26 = vpop.permute.xlu1 %742  ;;  %v839_v27 = vpop.permute.xlu0 %838 }
 0x28e   : > { %3154 = vmatpush3.xpose.msk.msra.mxu1 %vm744_vm2, %v743_v26 }
 0x28f   : > { %3158 = vmatprep.subr.mxu1 %v3500_v8 }
 0x291   : > { %3156 = vmatmul.mubr.msk.f32.vlgmr.msra.gmra.mxu1 %vm744_vm2, %v3710_v22  ;;  %v917_v45 = vpop.permute.xlu0 %916 }
 0x292   : > { %3159 = vmatpush3.msra.mxu1 %v839_v27  ;;  %3160 = vmatprep.mubr.msk.f32.mxu1 %vm3501_vm1, %v3500_v8 }
 0x293   : > { %3163 = vmatprep.subr.mxu1 %v3500_v8 }
 0x351   : > { %v815_v35 = vpop.f32.mrf.mxu1 }
 0x352   : > { %v819_v36 = vmul.f32 0.35355338, %v815_v35 }
 0x353   : > { %v3157_v37 = vpop.f32.mrf.mxu1 }
 0x354   : > { %v826_v38 = vadd.f32 %v3729_v34, %v819_v36  ;;  %v3370_v37 = vld [vmem:[%s4103_s6 + $0x8] sm:$0xff]  }
 0x356   : > { %v827_v39 = vsel %vm744_vm2, %v826_v38, -inf }
 0x357   : > { %828 = vmax.xlane.f32.xlu1 %v827_v39 }
 0x368   : > { %1083 = vrot.lane.b32.xlu1 %v3710_v22, %s4129_s21  ;;  %s4133_s21 = smov 8  }
 0x3e0   : > { %v829_v40 = vpop.xlane.xlu1 %828 }
 0x3e1   : > { %v830_v41 = vsub.f32 %v826_v38, %v829_v40  ;;  %v3371_v38 = vld [vmem:[%s4103_s6] sm:$0xff]  }
 0x3e3   : > { %v831_v42 = vmul.f32 1.442695, %v830_v41 }
 0x3e4   : > { %v1084_v51 = vpop.permute.xlu1 %1083 }
 0x3e5   : > { %3394 = vpow2.f32 %v831_v42 }
 0x3f2   : > { %v3395_v43 = vpop.eup %3394 }
 0x3f3   : > { %v833_v44 = vsel %vm744_vm2, %v3395_v43, 0.0 }
 0x3f4   : > { %834 = vadd.xlane.f32.xlu0 %v833_v44 }
 0x40a   : > { %914 = vrot.lane.b32.xlu0 %v3710_v22, %s4134_s30  ;;  %s4156_s30 = smov 80  }
 0x40e   : > { %1081 = vrot.lane.b32.xlu0 %v3710_v22, %s4130_s29  ;;  %s4132_s29 = smov 16  }
 0x412   : > { %1250 = vrot.lane.b32.xlu0 %v3710_v22, %s4127_s26  ;;  %s4161_s26 = smov 40  }
 0x416   : > { %1248 = vrot.lane.b32.xlu0 %v3710_v22, %s4128_s27  ;;  %s4154_s27 = smov 120  }
 0x47d   : > { %v835_v46 = vpop.xlane.xlu0 %834 }
 0x47e   : > { %3396 = vrcp.f32 %v835_v46 }
 0x481   : > { %v915_v47 = vpop.permute.xlu0 %914 }
 0x485   : > { %v1082_v50 = vpop.permute.xlu0 %1081 }
 0x489   : > { %v1251_v52 = vpop.permute.xlu0 %1250 }
 0x48b   : > { %v3397_v48 = vpop.eup %3396 }
 0x48c   : > { %v837_v49 = vmul.f32 %v3397_v48, %v3395_v43 }
 0x48d   : > { %v1249_v53 = vpop.permute.xlu0 %1248 }
 0x48e   : > { %3161 = vmatmul.mubr.msk.f32.vlgmr.msra.gmra.mxu1 %vm744_vm2, %v837_v49 }
 0x48f   : > { %3164 = vmatpush3.xpose.msk.msra.mxu1 %vm744_vm2, %v917_v45  ;;  %3165 = vmatprep.mubr.msk.f32.mxu1 %vm3501_vm1, %v3500_v8 }
 0x490   : > { %3173 = vmatprep.subr.mxu1 %v3500_v8 }
 0x492   : > { %3166 = vmatmul.mubr.msk.f32.vlgmr.msra.gmra.mxu1 %vm744_vm2, %v915_v47 }
 0x493   : > { %3174 = vmatpush3.xpose.msk.msra.mxu1 %vm744_vm2, %v1084_v51  ;;  %3175 = vmatprep.mubr.msk.f32.mxu1 %vm3501_vm1, %v3500_v8 }
 0x494   : > { %3183 = vmatprep.subr.mxu1 %v3500_v8 }
 0x496   : > { %3176 = vmatmul.mubr.msk.f32.vlgmr.msra.gmra.mxu1 %vm744_vm2, %v1082_v50 }
 0x497   : > { %3184 = vmatpush3.xpose.msk.msra.mxu1 %vm744_vm2, %v1251_v52  ;;  %3185 = vmatprep.mubr.msk.f32.mxu1 %vm3501_vm1, %v3500_v8  ;;  %v2990_v52 = vld [vmem:[%s4104_s7] ss:$0 sm:$0xff] }
 0x498   : > { %3193 = vmatprep.subr.bf16.mxu1 %v3500_v8 }
 0x49a   : > { %3186 = vmatmul.mubr.msk.f32.vlgmr.msra.gmra.mxu1 %vm744_vm2, %v1249_v53 }
 0x49b   : > { %3197 = vmatprep.mubr.msk.bf16.mxu1 %vm3501_vm1, %v3500_v8  ;;  %3194 = vmatpush3.bf16.msra.mxu1 %v3370_v37 }
 0x49c   : > { %3195 = vmatprep.subr.bf16.mxu1 %v3500_v8 }
 0x49f   : > { %3196 = vmatpush3.bf16.msra.mxu1 %v3371_v38 }
 0x4a0   : > { %3209 = vmatprep.subr.bf16.mxu1 %v3500_v8 }
 0x54e   : > { %v3762_v54 = vpop.f32.mrf.mxu1 }
 0x550   : > { %v3162_v55 = vpop.f32.mrf.mxu1 }
 0x552   : > { %v988_v56 = vpop.f32.mrf.mxu1 }
 0x553   : > { %v992_v57 = vmul.f32 0.35355338, %v988_v56 }
 0x554   : > { %v3167_v58 = vpop.f32.mrf.mxu1 }
 0x555   : > { %v993_v59 = vadd.f32 %v992_v57, %v3729_v34 }
 0x556   : > { %v1155_v60 = vpop.f32.mrf.mxu1 }
 0x557   : > { %v1159_v61 = vmul.f32 0.35355338, %v1155_v60  ;;  %v994_v62 = vsel %vm744_vm2, %v993_v59, -inf }
 0x558   : > { %995 = vmax.xlane.f32.xlu0 %v994_v62  ;;  %v3177_v63 = vpop.f32.mrf.mxu1 }
 0x559   : > { %v1160_v0 = vadd.f32 %v1159_v61, %v3729_v34 }
 0x55a   : > { %v1322_v1 = vpop.f32.mrf.mxu1 }
 0x55b   : > { %v1326_v2 = vmul.f32 0.35355338, %v1322_v1  ;;  %v1161_v3 = vsel %vm744_vm2, %v1160_v0, -inf  ;;  %v3372_v1 = vld [vmem:[%s4107_s10 + $0x8] sm:$0xff]  }
 0x55c   : > { %1162 = vmax.xlane.f32.xlu1 %v1161_v3  ;;  %v3187_v4 = vpop.f32.mrf.mxu1 }
 0x55d   : > { %v1327_v5 = vadd.f32 %v1326_v2, %v3729_v34 }
 0x55f   : > { %v1328_v6 = vsel %vm744_vm2, %v1327_v5, -inf }
 0x560   : > { %1329 = vmax.xlane.f32.xlu0 %v1328_v6  ;;  %v2994_v6 = vld [vmem:[%s4105_s8] ss:$0 sm:$0xff] }
 0x56d   : > { %1172 = vrot.lane.b32.xlu1 %v3710_v22, %s4123_s0  ;;  %s4126_s0 = smov 40  }
 0x5e1   : > { %v996_v7 = vpop.xlane.xlu0 %995 }
 0x5e2   : > { %v997_v9 = vsub.f32 %v993_v59, %v996_v7 }
 0x5e4   : > { %v998_v10 = vmul.f32 1.442695, %v997_v9  ;;  %v2995_v9 = vld [vmem:[%s4106_s9] ss:$0 sm:$0xff] }
 0x5e5   : > { %v1163_v11 = vpop.xlane.xlu1 %1162 }
 0x5e6   : > { %3398 = vpow2.f32 %v998_v10  ;;  %v1164_v12 = vsub.f32 %v1160_v0, %v1163_v11 }
 0x5e8   : > { %v1165_v13 = vmul.f32 1.442695, %v1164_v12 }
 0x5e9   : > { %v1330_v14 = vpop.xlane.xlu0 %1329  ;;  %v1173_v26 = vpop.permute.xlu1 %1172 }
 0x5ea   : > { %3400 = vpow2.f32 %v1165_v13  ;;  %v1331_v15 = vsub.f32 %v1327_v5, %v1330_v14  ;;  %v3374_v13 = vld [vmem:[%s4109_s12 + $0x18] sm:$0xff]   ;;  %v3375_v14 = vld [vmem:[%s4109_s12 + $0x10] sm:$0xff]  }
 0x5ec   : > { %v1332_v16 = vmul.f32 1.442695, %v1331_v15  ;;  %v3376_v15 = vld [vmem:[%s4109_s12 + $0x8] sm:$0xff]  }
 0x5ee   : > { %3402 = vpow2.f32 %v1332_v16  ;;  %v3377_v16 = vld [vmem:[%s4109_s12] sm:$0xff]  }
 0x5f3   : > { %v3399_v17 = vpop.eup %3398 }
 0x5f4   : > { %v1000_v19 = vsel %vm744_vm2, %v3399_v17, 0.0 }
 0x5f5   : > { %1001 = vadd.xlane.f32.xlu0 %v1000_v19 }
 0x5f7   : > { %v3401_v20 = vpop.eup %3400 }
 0x5f8   : > { %v1167_v21 = vsel %vm744_vm2, %v3401_v20, 0.0 }
 0x5f9   : > { %1168 = vadd.xlane.f32.xlu0 %v1167_v21 }
 0x5fb   : > { %v3403_v23 = vpop.eup %3402 }
 0x5fc   : > { %v1334_v24 = vsel %vm744_vm2, %v3403_v23, 0.0 }
 0x5fd   : > { %1335 = vadd.xlane.f32.xlu1 %v1334_v24 }
 0x60e   : > { %1339 = vrot.lane.b32.xlu1 %v3710_v22, %s4126_s0  ;;  %s4158_s0 = smov 72  }
 0x60f   : > { %1005 = vrot.lane.b32.xlu0 %v3710_v22, %s4125_s23  ;;  %s4131_s23 = smov 24  }
 0x67e   : > { %v1002_v25 = vpop.xlane.xlu0 %1001 }
 0x67f   : > { %3404 = vrcp.f32 %v1002_v25 }
 0x682   : > { %v1169_v27 = vpop.xlane.xlu0 %1168 }
 0x683   : > { %3406 = vrcp.f32 %v1169_v27 }
 0x686   : > { %v1336_v28 = vpop.xlane.xlu1 %1335  ;;  %v1006_v29 = vpop.permute.xlu0 %1005 }
 0x687   : > { %3408 = vrcp.f32 %v1336_v28  ;;  %3169 = vmatpush3.msra.mxu0 %v1006_v29 }
 0x688   : > { %3178 = vmatprep.subr.mxu0 %v3500_v8 }
 0x68a   : > { %v1340_v33 = vpop.permute.xlu1 %1339 }
 0x68c   : > { %v3405_v30 = vpop.eup %3404 }
 0x68d   : > { %v1004_v31 = vmul.f32 %v3405_v30, %v3399_v17  ;;  %v2996_v17 = vld [vmem:[%s4108_s11] ss:$0 sm:$0xff] }
 0x68f   : > { %3171 = vmatmul.mubr.msk.f32.vlgmr.msra.gmra.mxu0 %vm744_vm2, %v1004_v31 }
 0x690   : > { %v3407_v32 = vpop.eup %3406  ;;  %3179 = vmatpush3.msra.mxu0 %v1173_v26  ;;  %3180 = vmatprep.mubr.msk.f32.mxu0 %vm3501_vm1, %v3500_v8 }
 0x691   : > { %3188 = vmatprep.subr.mxu0 %v3500_v8  ;;  %v1171_v22 = vmul.f32 %v3407_v32, %v3401_v20 }
 0x693   : > { %3181 = vmatmul.mubr.msk.f32.vlgmr.msra.gmra.mxu0 %vm744_vm2, %v1171_v22 }
 0x694   : > { %v3409_v35 = vpop.eup %3408  ;;  %3189 = vmatpush3.msra.mxu0 %v1340_v33  ;;  %3190 = vmatprep.mubr.msk.f32.mxu0 %vm3501_vm1, %v3500_v8 }
 0x695   : > { %v1338_v36 = vmul.f32 %v3409_v35, %v3403_v23  ;;  %3201 = vmatprep.subr.bf16.mxu0 %v3500_v8  ;;  %v3000_v35 = vld [vmem:[%s4110_s13] ss:$0 sm:$0xff] }
 0x697   : > { %3191 = vmatmul.mubr.msk.f32.vlgmr.msra.gmra.mxu0 %vm744_vm2, %v1338_v36 }
 0x698   : > { %3205 = vmatprep.mubr.msk.bf16.mxu0 %vm3501_vm1, %v3500_v8  ;;  %3202 = vmatpush3.bf16.msra.mxu0 %v3372_v1 }
 0x699   : > { %3203 = vmatprep.subr.bf16.mxu0 %v3500_v8 }
 0x74f   : > { %v1077_v39 = vpop.f32.mrf.mxu0 }
 0x750   : > { %1416 = vrot.lane.b32.xlu1 %v1077_v39, %s4133_s21  ;;  %s4155_s21 = smov 112  }
 0x751   : > { %v3172_v40 = vpop.f32.mrf.mxu0 }
 0x753   : > { %v1244_v41 = vpop.f32.mrf.mxu0 }
 0x754   : > { %1420 = vrot.lane.b32.xlu0 %v1244_v41, %s4132_s29  ;;  %s4157_s29 = smov 104  }
 0x755   : > { %v3182_v42 = vpop.f32.mrf.mxu0 }
 0x757   : > { %v1411_v43 = vpop.f32.mrf.mxu0 }
 0x758   : > { %1424 = vrot.lane.b32.xlu1 %v1411_v43, %s4131_s23  ;;  %s4162_s23 = smov 56  }
 0x759   : > { %v3192_v44 = vpop.f32.mrf.mxu0 }
 0x7c2   : > { %v1417_v45 = vpop.permute.xlu1 %1416 }
 0x7c3   : > { %v1427_v47 = vsel %vm744_vm2, %v3762_v54, %v1417_v45 }
 0x7c6   : > { %v1421_v46 = vpop.permute.xlu0 %1420 }
 0x7c7   : > { %v1429_v48 = vsel %vm1428_vm3, %v1427_v47, %v1421_v46 }
 0x7ca   : > { %v1425_v49 = vpop.permute.xlu1 %1424 }
 0x7cb   : > { %v1431_v50 = vsel %vm1430_vm4, %v1429_v48, %v1425_v49  ;;  %v3378_v48 = vld [vmem:[%s4149_s3 + $0x18] sm:$0xff]   ;;  %v3379_v49 = vld [vmem:[%s4149_s3 + $0x10] sm:$0xff]  }
 0x7cc   : > { %v1432_v51 = vpack.c.bf16 %v1431_v50, %v1431_v50 }
 0x7ce   : > { %3198 = vmatmul.mubr.msk.bf16.vlgmr.msra.gmra.mxu1 %vm645_vm0, %v1432_v51 }
 0x7cf   : > { %3217 = vmatprep.mubr.msk.bf16.mxu1 %vm3501_vm1, %v3500_v8  ;;  %3210 = vmatpush3.bf16.msra.mxu1 %v3374_v13 }
 0x7d0   : > { %3211 = vmatprep.subr.bf16.mxu1 %v3500_v8 }
 0x7d3   : > { %3212 = vmatpush3.bf16.msra.mxu1 %v3375_v14 }
 0x7d4   : > { %3213 = vmatprep.subr.bf16.mxu1 %v3500_v8 }
 0x7d7   : > { %3214 = vmatpush3.bf16.msra.mxu1 %v3376_v15 }
 0x7d8   : > { %3215 = vmatprep.subr.bf16.mxu1 %v3500_v8 }
 0x7db   : > { %3216 = vmatpush3.bf16.msra.mxu1 %v3377_v16 }
 0x7dc   : > { %3239 = vmatprep.subr.mxu1 %v3500_v8 }
 0x88e   : > { %v1493_v53 = vpop.f32.mrf.mxu1 }
 0x88f   : > { %v1494_v55 = vadd.f32 %v2990_v52, %v1493_v53 }
 0x890   : > { %v3199_v56 = vpop.f32.mrf.mxu1 }
 0x891   : > { %v1499_v54 = vadd.f32 %v1494_v55, %v3700_v18  ;;  %v3373_v18 = vld [vmem:[%s4107_s10] sm:$0xff]  }
 0x892   : > { %v1496_v57 = vpop.f32.mrf.mxu1  ;;  %3204 = vmatpush3.bf16.msra.mxu0 %v3373_v18  ;;  %v3006_v55 = vld [vmem:[%s4111_s14] ss:$0 sm:$0xff] }
 0x893   : > { %v1502_v58 = vsel %vm645_vm0, %v1499_v54, 0.0  ;;  %3221 = vmatprep.subr.bf16.mxu0 %v3500_v8 }
 0x894   : > { %1503 = vadd.xlane.f32.xlu0 %v1502_v58  ;;  %v3200_v59 = vpop.f32.mrf.mxu1 }
 0x91d   : > { %v1504_v60 = vpop.xlane.xlu0 %1503 }
 0x91e   : > { %v1505_v61 = vmul.f32 0.03125, %v1504_v60  ;;  %v3013_v60 = vld [vmem:[%s4152_s5 + $0x1] ss:$0 sm:$0xff] }
 0x920   : > { %v1506_v62 = vsub.f32 %v1499_v54, %v1505_v61  ;;  %v3007_v54 = vld [vmem:[%s4112_s15] ss:$0 sm:$0xff] }
 0x922   : > { %v1507_v63 = vmul.f32 %v1506_v62, %v1506_v62 }
 0x924   : > { %v1508_v0 = vsel %vm645_vm0, %v1507_v63, 0.0 }
 0x925   : > { %1509 = vadd.xlane.f32.xlu1 %v1508_v0 }
 0x9ae   : > { %v1510_v2 = vpop.xlane.xlu1 %1509 }
 0x9af   : > { %v1511_v3 = vmul.f32 0.03125, %v1510_v2 }
 0x9b1   : > { %v1512_v4 = vadd.f32 1e-05, %v1511_v3 }
 0x9b3   : > { %3410 = vrsqrt.f32 %v1512_v4 }
 0x9c0   : > { %v3411_v5 = vpop.eup %3410 }
 0x9c1   : > { %v1514_v7 = vmul.f32 %v3411_v5, %v1506_v62 }
 0x9c3   : > { %v1521_v10 = vmul.f32 %v2994_v6, %v1514_v7 }
 0x9c5   : > { %v1528_v11 = vadd.f32 %v2995_v9, %v1521_v10 }
 0x9c7   : > { %v1529_v12 = vpack.c.bf16 %v1528_v11, %v1528_v11 }
 0x9c9   : > { %3206 = vmatmul.mubr.msk.bf16.vlgmr.msra.gmra.mxu0 %vm645_vm0, %v1529_v12 }
 0x9ca   : > { %3225 = vmatprep.mubr.msk.bf16.mxu0 %vm3501_vm1, %v3500_v8  ;;  %3222 = vmatpush3.bf16.msra.mxu0 %v3378_v48 }
 0x9cb   : > { %3223 = vmatprep.subr.bf16.mxu0 %v3500_v8 }
 0x9ce   : > { %3224 = vmatpush3.bf16.msra.mxu0 %v3379_v49 }
 0x9cf   : > { %3229 = vmatprep.subr.mxu0 %v3500_v8 }
 0xa89   : > { %v1590_v19 = vpop.f32.mrf.mxu0 }
 0xa8a   : > { %v1591_v20 = vadd.f32 %v2996_v17, %v1590_v19 }
 0xa8b   : > { %v3207_v21 = vpop.f32.mrf.mxu0 }
 0xa8c   : > { %v1596_v23 = vmul.f32 %v1591_v20, %v1591_v20 }
 0xa8d   : > { %v1593_v24 = vpop.f32.mrf.mxu0 }
 0xa8e   : > { %v1597_v25 = vmul.f32 %v1596_v23, %v1591_v20 }
 0xa8f   : > { %v3208_v26 = vpop.f32.mrf.mxu0 }
 0xa90   : > { %v1598_v27 = vmul.f32 0.044715, %v1597_v25 }
 0xa92   : > { %v1599_v28 = vadd.f32 %v1598_v27, %v1591_v20 }
 0xa94   : > { %v1600_v29 = vmul.f32 0.7978846, %v1599_v28 }
 0xa96   : > { %3412 = vtanh.f32 %v1600_v29 }
 0xaa3   : > { %v3413_v30 = vpop.eup %3412 }
 0xaa4   : > { %v1602_v31 = vadd.f32 1.0, %v3413_v30 }
 0xaa6   : > { %v1603_v32 = vmul.f32 0.5, %v1602_v31 }
 0xaa8   : > { %v1604_v22 = vmul.f32 %v1603_v32, %v1591_v20 }
 0xaaa   : > { %v1605_v33 = vpack.c.bf16 %v1604_v22, %v1604_v22 }
 0xaac   : > { %3218 = vmatmul.mubr.msk.bf16.vlgmr.msra.gmra.mxu1 %vm1645_vm5, %v1605_v33 }
 0xaad   : > { %3241 = vmatprep.mubr.msk.f32.mxu1 %vm3501_vm1, %v3500_v8 }
 0xb6c   : > { %v1683_v36 = vpop.f32.mrf.mxu1 }
 0xb6d   : > { %v1684_v37 = vadd.f32 %v3000_v35, %v1683_v36 }
 0xb6e   : > { %v3219_v38 = vpop.f32.mrf.mxu1 }
 0xb6f   : > { %v1689_v39 = vadd.f32 %v1684_v37, %v1528_v11 }
 0xb70   : > { %v1686_v40 = vpop.f32.mrf.mxu1 }
 0xb71   : > { %v1692_v41 = vsel %vm645_vm0, %v1689_v39, 0.0 }
 0xb72   : > { %1693 = vadd.xlane.f32.xlu0 %v1692_v41  ;;  %v3220_v42 = vpop.f32.mrf.mxu1 }
 0xbfb   : > { %v1694_v43 = vpop.xlane.xlu0 %1693 }
 0xbfc   : > { %v1695_v44 = vmul.f32 0.03125, %v1694_v43 }
 0xbfe   : > { %v1696_v45 = vsub.f32 %v1689_v39, %v1695_v44 }
 0xc00   : > { %v1697_v46 = vmul.f32 %v1696_v45, %v1696_v45 }
 0xc02   : > { %v1698_v47 = vsel %vm645_vm0, %v1697_v46, 0.0 }
 0xc03   : > { %1699 = vadd.xlane.f32.xlu0 %v1698_v47 }
 0xc8c   : > { %v1700_v50 = vpop.xlane.xlu0 %1699 }
 0xc8d   : > { %v1701_v51 = vmul.f32 0.03125, %v1700_v50 }
 0xc8f   : > { %v1702_v52 = vadd.f32 1e-05, %v1701_v51 }
 0xc91   : > { %3414 = vrsqrt.f32 %v1702_v52 }
 0xc9e   : > { %v3415_v53 = vpop.eup %3414 }
 0xc9f   : > { %v1704_v56 = vmul.f32 %v3415_v53, %v1696_v45 }
 0xca1   : > { %v1711_v57 = vmul.f32 %v3006_v55, %v1704_v56 }
 0xca3   : > { %v3873_v58 = vadd.f32 %v3007_v54, %v1711_v57 }
 0xca5   : > { %v1719_v59 = vpack.c.bf16 %v3873_v58, %v3873_v58 }
 0xca7   : > { %3226 = vmatmul.mubr.msk.bf16.vlgmr.msra.gmra.mxu0 %vm645_vm0, %v1719_v59 }
 0xca8   : > { %3231 = vmatprep.mubr.msk.f32.mxu0 %vm3501_vm1, %v3500_v8 }
 0xd67   : > { %v1782_v61 = vpop.f32.mrf.mxu0 }
 0xd68   : > { %v3883_v62 = vadd.f32 %v3013_v60, %v1782_v61 }
 0xd69   : > { %v3227_v63 = vpop.f32.mrf.mxu0 }
 0xd6a   : > { %1956 = vrot.lane.b32.xlu1 %v3883_v62, %s3504_s25  ;;  %1789 = vrot.lane.b32.xlu0 %v3883_v62, %s3503_s28  ;;  %s4159_s28 = smov 64   ;;  %s4160_s25 = smov 48  }
 0xd6b   : > { %v1785_v0 = vpop.f32.mrf.mxu0 }
 0xd6d   : > { %v3228_v1 = vpop.f32.mrf.mxu0 }
 0xd6e   : > { %1954 = vrot.lane.b32.xlu1 %v3883_v62, %s4154_s27  ;;  %2121 = vrot.lane.b32.xlu0 %v3883_v62, %s4155_s21  ;;  %s3076_s21 = sshll.u32 %s3643_s2, 4  ;;  %s3516_s2 = smov [#allocation2]  }
 0xd6f   : > { %s3442_s3 = sshll.u32 %s3516_s2, 4  ;;  %s3443_s3 = int_to_ptr.vmem [resolvable:$false] %s3442_s3 }
 0xd72   : > { %2123 = vrot.lane.b32.xlu1 %v3883_v62, %s4156_s30  ;;  %2288 = vrot.lane.b32.xlu0 %v3883_v62, %s4157_s29 }
 0xd76   : > { %2290 = vrot.lane.b32.xlu1 %v3883_v62, %s4158_s0  ;;  %s4163_s0 = smov 8  }
 0xddc   : > { %v1957_v18 = vpop.permute.xlu1 %1956  ;;  %v1790_v2 = vpop.permute.xlu0 %1789 }
 0xddd   : > { %3230 = vmatpush3.xpose.msk.msra.mxu0 %vm744_vm2, %v1790_v2  ;;  %3240 = vmatpush3.xpose.msk.msra.mxu1 %vm744_vm2, %v1957_v18  ;;  %v3380_v2 = vld [vmem:[%s4103_s6 + $0x18] sm:$0xff]  }
 0xdde   : > { %3249 = vmatprep.subr.mxu1 %v3500_v8  ;;  %3234 = vmatprep.subr.mxu0 %v3500_v8 }
 0xde0   : > { %v1955_v3 = vpop.permute.xlu1 %1954  ;;  %3232 = vmatmul.mubr.msk.f32.vlgmr.msra.gmra.mxu0 %vm744_vm2, %v3883_v62  ;;  %v2122_v5 = vpop.permute.xlu0 %2121 }
 0xde1   : > { %3242 = vmatmul.mubr.msk.f32.vlgmr.msra.gmra.mxu1 %vm744_vm2, %v1955_v3  ;;  %3236 = vmatprep.mubr.msk.f32.mxu0 %vm3501_vm1, %v3500_v8  ;;  %v3381_v3 = vld [vmem:[%s4103_s6 + $0x10] sm:$0xff]  }
 0xde2   : > { %3251 = vmatprep.mubr.msk.f32.mxu1 %vm3501_vm1, %v3500_v8 }
 0xde4   : > { %v2124_v4 = vpop.permute.xlu1 %2123  ;;  %v2289_v7 = vpop.permute.xlu0 %2288 }
 0xde5   : > { %3250 = vmatpush3.xpose.msk.msra.mxu1 %vm744_vm2, %v2124_v4 }
 0xde6   : > { %3259 = vmatprep.subr.mxu1 %v3500_v8 }
 0xde8   : > { %v2291_v6 = vpop.permute.xlu1 %2290  ;;  %3252 = vmatmul.mubr.msk.f32.vlgmr.msra.gmra.mxu1 %vm744_vm2, %v2122_v5 }
 0xde9   : > { %3260 = vmatpush3.xpose.msk.msra.mxu1 %vm744_vm2, %v2291_v6  ;;  %3261 = vmatprep.mubr.msk.f32.mxu1 %vm3501_vm1, %v3500_v8 }
 0xdea   : > { %3269 = vmatprep.subr.bf16.mxu1 %v3500_v8 }
 0xdec   : > { %3262 = vmatmul.mubr.msk.f32.vlgmr.msra.gmra.mxu1 %vm744_vm2, %v2289_v7 }
 0xded   : > { %3273 = vmatprep.mubr.msk.bf16.mxu1 %vm3501_vm1, %v3500_v8  ;;  %3270 = vmatpush3.bf16.msra.mxu1 %v3380_v2 }
 0xdee   : > { %3271 = vmatprep.subr.bf16.mxu1 %v3500_v8 }
 0xdf1   : > { %3272 = vmatpush3.bf16.msra.mxu1 %v3381_v3 }
 0xdf2   : > { %3285 = vmatprep.subr.bf16.mxu1 %v3500_v8 }
 0xea0   : > { %v1861_v9 = vpop.f32.mrf.mxu0 }
 0xea1   : > { %v1865_v10 = vmul.f32 0.35355338, %v1861_v9  ;;  %v2028_v11 = vpop.f32.mrf.mxu1 }
 0xea2   : > { %v2032_v12 = vmul.f32 0.35355338, %v2028_v11  ;;  %v3233_v13 = vpop.f32.mrf.mxu0 }
 0xea3   : > { %v3243_v14 = vpop.f32.mrf.mxu1  ;;  %v1866_v15 = vadd.f32 %v1865_v10, %v3729_v34 }
 0xea4   : > { %v2033_v16 = vadd.f32 %v2032_v12, %v3729_v34 }
 0xea5   : > { %v1867_v17 = vsel %vm744_vm2, %v1866_v15, -inf }
 0xea6   : > { %1868 = vmax.xlane.f32.xlu1 %v1867_v17  ;;  %v2034_v19 = vsel %vm744_vm2, %v2033_v16, -inf }
 0xea7   : > { %2035 = vmax.xlane.f32.xlu0 %v2034_v19 }
 0xea8   : > { %v2195_v20 = vpop.f32.mrf.mxu1 }
 0xea9   : > { %v2199_v21 = vmul.f32 0.35355338, %v2195_v20 }
 0xeaa   : > { %v3253_v23 = vpop.f32.mrf.mxu1 }
 0xeab   : > { %v2200_v24 = vadd.f32 %v2199_v21, %v3729_v34  ;;  %v3034_v21 = vld [vmem:[%s4104_s7 + $0x1] ss:$0 sm:$0xff] }
 0xeac   : > { %v2362_v25 = vpop.f32.mrf.mxu1 }
 0xead   : > { %v2366_v26 = vmul.f32 0.35355338, %v2362_v25  ;;  %v2201_v27 = vsel %vm744_vm2, %v2200_v24, -inf }
 0xeae   : > { %2202 = vmax.xlane.f32.xlu0 %v2201_v27  ;;  %v3263_v28 = vpop.f32.mrf.mxu1 }
 0xeaf   : > { %v2367_v29 = vadd.f32 %v2366_v26, %v3729_v34 }
 0xeb1   : > { %v2368_v30 = vsel %vm744_vm2, %v2367_v29, -inf }
 0xeb2   : > { %2369 = vmax.xlane.f32.xlu0 %v2368_v30 }
 0xeb7   : > { %1878 = vrot.lane.b32.xlu1 %v3883_v62, %s4159_s28  ;;  %s4164_s28 = smov 16  }
 0xf2f   : > { %v1869_v31 = vpop.xlane.xlu1 %1868 }
 0xf30   : > { %v1870_v32 = vsub.f32 %v1866_v15, %v1869_v31  ;;  %v2036_v22 = vpop.xlane.xlu0 %2035 }
 0xf31   : > { %v2037_v33 = vsub.f32 %v2033_v16, %v2036_v22 }
 0xf32   : > { %v1871_v35 = vmul.f32 1.442695, %v1870_v32 }
 0xf33   : > { %v2038_v36 = vmul.f32 1.442695, %v2037_v33  ;;  %v1879_v37 = vpop.permute.xlu1 %1878 }
 0xf34   : > { %3416 = vpow2.f32 %v1871_v35  ;;  %3235 = vmatpush3.msra.mxu0 %v1879_v37  ;;  %v3382_v35 = vld [vmem:[%s4107_s10 + $0x18] sm:$0xff]  }
 0xf35   : > { %3418 = vpow2.f32 %v2038_v36  ;;  %3244 = vmatprep.subr.mxu0 %v3500_v8 }
 0xf37   : > { %v2203_v38 = vpop.xlane.xlu0 %2202 }
 0xf38   : > { %v2204_v34 = vsub.f32 %v2200_v24, %v2203_v38 }
 0xf3a   : > { %v2205_v39 = vmul.f32 1.442695, %v2204_v34 }
 0xf3b   : > { %v2370_v40 = vpop.xlane.xlu0 %2369 }
 0xf3c   : > { %3420 = vpow2.f32 %v2205_v39  ;;  %v2371_v41 = vsub.f32 %v2367_v29, %v2370_v40  ;;  %v3040_v39 = vld [vmem:[%s4105_s8 + $0x1] ss:$0 sm:$0xff] }
 0xf3e   : > { %v2372_v42 = vmul.f32 1.442695, %v2371_v41  ;;  %v3041_v41 = vld [vmem:[%s4106_s9 + $0x1] ss:$0 sm:$0xff] }
 0xf40   : > { %3422 = vpow2.f32 %v2372_v42 }
 0xf41   : > { %v3417_v43 = vpop.eup %3416 }
 0xf42   : > { %v3419_v44 = vpop.eup %3418  ;;  %v1873_v45 = vsel %vm744_vm2, %v3417_v43, 0.0 }
 0xf43   : > { %1874 = vadd.xlane.f32.xlu1 %v1873_v45  ;;  %v2040_v46 = vsel %vm744_vm2, %v3419_v44, 0.0  ;;  %v3384_v45 = vld [vmem:[%s4109_s12 + $0x38] sm:$0xff]  }
 0xf44   : > { %2041 = vadd.xlane.f32.xlu0 %v2040_v46  ;;  %v3385_v46 = vld [vmem:[%s4109_s12 + $0x30] sm:$0xff]  }
 0xf49   : > { %v3421_v47 = vpop.eup %3420 }
 0xf4a   : > { %v2207_v48 = vsel %vm744_vm2, %v3421_v47, 0.0 }
 0xf4b   : > { %2208 = vadd.xlane.f32.xlu1 %v2207_v48  ;;  %v3387_v48 = vld [vmem:[%s4109_s12 + $0x20] sm:$0xff]  }
 0xf4d   : > { %v3423_v49 = vpop.eup %3422 }
 0xf4e   : > { %v2374_v50 = vsel %vm744_vm2, %v3423_v49, 0.0 }
 0xf4f   : > { %2375 = vadd.xlane.f32.xlu0 %v2374_v50 }
 0xf5c   : > { %2212 = vrot.lane.b32.xlu1 %v3883_v62, %s4160_s25  ;;  %s4165_s25 = smov 24  }
 0xf60   : > { %2379 = vrot.lane.b32.xlu1 %v3883_v62, %s4161_s26  ;;  %s629_s26 = sand.u32 1, %s3490_s22  }
 0xf61   : > { %s630_s30 = scalar_lea.vmem [#allocation2], %s629_s26 }
 0xf62   : > { %s2903_s29 = sshll.u32 %s630_s30, 4  ;;  %s4058_s29 = int_to_ptr.vmem [resolvable:$true] %s2903_s29 }
 0xf63   : > { %s3438_s27 = scalar_lea.vmem %s4058_s29, 16  ;;  %p3445_p0 = scmp.lt.s32.totalorder %s4058_s29, %s3443_s3 }
 0xf64   : > { %p3439_p11 = scmp.ne.s32.totalorder %s4058_s29, %s3438_s27 }
 0xf65   : > { %2045 = vrot.lane.b32.xlu0 %v3883_v62, %s4162_s23  ;;  %s2891_s23 = scalar_lea.sflag [#allocation3], %s629_s26 }
 0xf66   : > { %p3440_p12 = pnand %p3439_p11, %p3660_p5 }
 0xf68   : > { %p3441_p13 = pneg %p3440_p12 }
 0xfcc   : > { %v1875_v51 = vpop.xlane.xlu1 %1874 }
 0xfcd   : > { %3424 = vrcp.f32 %v1875_v51  ;;  %v2042_v52 = vpop.xlane.xlu0 %2041 }
 0xfce   : > { %3426 = vrcp.f32 %v2042_v52 }
 0xfd4   : > { %v2209_v53 = vpop.xlane.xlu1 %2208 }
 0xfd5   : > { %3428 = vrcp.f32 %v2209_v53 }
 0xfd8   : > { %v2376_v55 = vpop.xlane.xlu0 %2375  ;;  %v2213_v60 = vpop.permute.xlu1 %2212 }
 0xfd9   : > { %3430 = vrcp.f32 %v2376_v55 }
 0xfda   : > { %v3425_v56 = vpop.eup %3424 }
 0xfdb   : > { %v1877_v54 = vmul.f32 %v3425_v56, %v3417_v43  ;;  %v3427_v57 = vpop.eup %3426 }
 0xfdc   : > { %v2046_v59 = vpop.permute.xlu0 %2045  ;;  %v2044_v61 = vmul.f32 %v3427_v57, %v3419_v44  ;;  %v2380_v0 = vpop.permute.xlu1 %2379 }
 0xfdd   : > { %3237 = vmatmul.mubr.msk.f32.vlgmr.msra.gmra.mxu0 %vm744_vm2, %v1877_v54 }
 0xfde   : > { %3245 = vmatpush3.msra.mxu0 %v2046_v59  ;;  %3246 = vmatprep.mubr.msk.f32.mxu0 %vm3501_vm1, %v3500_v8 }
 0xfdf   : > { %3254 = vmatprep.subr.mxu0 %v3500_v8 }
 0xfe1   : > { %3247 = vmatmul.mubr.msk.f32.vlgmr.msra.gmra.mxu0 %vm744_vm2, %v2044_v61 }
 0xfe2   : > { %v3429_v62 = vpop.eup %3428  ;;  %3255 = vmatpush3.msra.mxu0 %v2213_v60  ;;  %3256 = vmatprep.mubr.msk.f32.mxu0 %vm3501_vm1, %v3500_v8 }
 0xfe3   : > { %3264 = vmatprep.subr.mxu0 %v3500_v8  ;;  %v2211_v63 = vmul.f32 %v3429_v62, %v3421_v47  ;;  %v3386_v47 = vld [vmem:[%s4109_s12 + $0x28] sm:$0xff]  }
 0xfe5   : > { %3257 = vmatmul.mubr.msk.f32.vlgmr.msra.gmra.mxu0 %vm744_vm2, %v2211_v63 }
 0xfe6   : > { %v3431_v1 = vpop.eup %3430  ;;  %3265 = vmatpush3.msra.mxu0 %v2380_v0  ;;  %3266 = vmatprep.mubr.msk.f32.mxu0 %vm3501_vm1, %v3500_v8 }
 0xfe7   : > { %v2378_v18 = vmul.f32 %v3431_v1, %v3423_v49  ;;  %3277 = vmatprep.subr.bf16.mxu0 %v3500_v8  ;;  %v3047_v49 = vld [vmem:[%s4108_s11 + $0x1] ss:$0 sm:$0xff] }
 0xfe9   : > { %3267 = vmatmul.mubr.msk.f32.vlgmr.msra.gmra.mxu0 %vm744_vm2, %v2378_v18  ;;  %v3060_v18 = vld [vmem:[%s4110_s13 + $0x1] ss:$0 sm:$0xff] }
 0xfea   : > { %3281 = vmatprep.mubr.msk.bf16.mxu0 %vm3501_vm1, %v3500_v8  ;;  %3278 = vmatpush3.bf16.msra.mxu0 %v3382_v35 }
 0xfeb   : > { %3279 = vmatprep.subr.bf16.mxu0 %v3500_v8 }
0x109d   : > { %v1950_v4 = vpop.f32.mrf.mxu0 }
0x109f   : > { %v3238_v5 = vpop.f32.mrf.mxu0 }
0x10a1   : > { %v2117_v6 = vpop.f32.mrf.mxu0 }
0x10a2   : > { %2456 = vrot.lane.b32.xlu1 %v2117_v6, %s4163_s0  ;;  %s3444_s0 = scalar_lea.vmem %s3443_s3, 32 }
0x10a3   : > { %v3248_v7 = vpop.f32.mrf.mxu0  ;;  %p3446_p1 = scmp.lt.s32.totalorder %s3444_s0, %s3438_s27 }
0x10a5   : > { %v2284_v9 = vpop.f32.mrf.mxu0  ;;  %p3447_p2 = por %p3446_p1, %p3445_p0 }
0x10a6   : > { %2460 = vrot.lane.b32.xlu0 %v2284_v9, %s4164_s28 }
0x10a7   : > { %v3258_v10 = vpop.f32.mrf.mxu0  ;;  %p3448_p3 = pnand %p3447_p2, %p3441_p13 }
0x10a9   : > { %v2451_v11 = vpop.f32.mrf.mxu0 }
0x10aa   : > { %2464 = vrot.lane.b32.xlu1 %v2451_v11, %s4165_s25  ;;  %s4056_s25 = scalar_lea.hbm %s4117_s20, %s3076_s21 }
0x10ab   : > { %v3268_v12 = vpop.f32.mrf.mxu0 }
0x1114   : > { %v2457_v13 = vpop.permute.xlu1 %2456 }
0x1115   : > { %v2467_v15 = vsel %vm744_vm2, %v1950_v4, %v2457_v13 }
0x1118   : > { %v2461_v14 = vpop.permute.xlu0 %2460 }
0x1119   : > { %v2468_v16 = vsel %vm1428_vm3, %v2467_v15, %v2461_v14  ;;  %v3388_v15 = vld [vmem:[%s4113_s16 + $0x8] sm:$0xff]  }
0x111c   : > { %v2465_v17 = vpop.permute.xlu1 %2464 }
0x111d   : > { %v2469_v19 = vsel %vm1430_vm4, %v2468_v16, %v2465_v17  ;;  %v3389_v16 = vld [vmem:[%s4113_s16] sm:$0xff]  }
0x111e   : > { %v2470_v20 = vpack.c.bf16 %v2469_v19, %v2469_v19 }
0x1120   : > { %3274 = vmatmul.mubr.msk.bf16.vlgmr.msra.gmra.mxu1 %vm645_vm0, %v2470_v20 }
0x1121   : > { %3293 = vmatprep.mubr.msk.bf16.mxu1 %vm3501_vm1, %v3500_v8  ;;  %3286 = vmatpush3.bf16.msra.mxu1 %v3384_v45 }
0x1122   : > { %3287 = vmatprep.subr.bf16.mxu1 %v3500_v8 }
0x1125   : > { %3288 = vmatpush3.bf16.msra.mxu1 %v3385_v46 }
0x1126   : > { %3289 = vmatprep.subr.bf16.mxu1 %v3500_v8 }
0x1129   : > { %3290 = vmatpush3.bf16.msra.mxu1 %v3386_v47 }
0x112a   : > { %3291 = vmatprep.subr.bf16.mxu1 %v3500_v8 }
0x112d   : > { %3292 = vmatpush3.bf16.msra.mxu1 %v3387_v48 }
0x11e0   : > { %v2533_v23 = vpop.f32.mrf.mxu1 }
0x11e1   : > { %v2534_v24 = vadd.f32 %v3034_v21, %v2533_v23  ;;  %v3068_v23 = vld [vmem:[%s4111_s14 + $0x1] ss:$0 sm:$0xff] }
0x11e2   : > { %v3275_v25 = vpop.f32.mrf.mxu1 }
0x11e3   : > { %v2539_v26 = vadd.f32 %v2534_v24, %v3873_v58  ;;  %v3383_v58 = vld [vmem:[%s4107_s10 + $0x10] sm:$0xff]   ;;  %v3069_v25 = vld [vmem:[%s4112_s15 + $0x1] ss:$0 sm:$0xff] }
0x11e4   : > { %v2536_v27 = vpop.f32.mrf.mxu1  ;;  %3280 = vmatpush3.bf16.msra.mxu0 %v3383_v58 }
0x11e5   : > { %v2544_v28 = vsel %vm645_vm0, %v2539_v26, 0.0  ;;  %3297 = vmatprep.subr.bf16.mxu0 %v3500_v8 }
0x11e6   : > { %2545 = vadd.xlane.f32.xlu0 %v2544_v28  ;;  %v3276_v29 = vpop.f32.mrf.mxu1 }
0x11e7   : > { %v3390_v29 = vld [vmem:[%s4115_s18 + $0x8] sm:$0xff]  }
0x126f   : > { %v2546_v30 = vpop.xlane.xlu0 %2545 }
0x1270   : > { %v2547_v31 = vmul.f32 0.03125, %v2546_v30  ;;  %v3391_v30 = vld [vmem:[%s4115_s18] sm:$0xff]  }
0x1272   : > { %v2548_v32 = vsub.f32 %v2539_v26, %v2547_v31  ;;  %v2771_v31 = vld [vmem:[%s4114_s17] sm:$0x1] }
0x1274   : > { %v2549_v22 = vmul.f32 %v2548_v32, %v2548_v32 }
0x1276   : > { %v2550_v33 = vsel %vm645_vm0, %v2549_v22, 0.0 }
0x1277   : > { %2551 = vadd.xlane.f32.xlu1 %v2550_v33 }
0x1300   : > { %v2552_v36 = vpop.xlane.xlu1 %2551 }
0x1301   : > { %v2553_v37 = vmul.f32 0.03125, %v2552_v36 }
0x1303   : > { %v2554_v38 = vadd.f32 1e-05, %v2553_v37 }
0x1305   : > { %3432 = vrsqrt.f32 %v2554_v38 }
0x1312   : > { %v3433_v34 = vpop.eup %3432 }
0x1313   : > { %v2556_v40 = vmul.f32 %v3433_v34, %v2548_v32 }
0x1315   : > { %v2563_v42 = vmul.f32 %v3040_v39, %v2556_v40 }
0x1317   : > { %v2570_v43 = vadd.f32 %v3041_v41, %v2563_v42 }
0x1319   : > { %v2571_v44 = vpack.c.bf16 %v2570_v43, %v2570_v43 }
0x131b   : > { %3282 = vmatmul.mubr.msk.bf16.vlgmr.msra.gmra.mxu0 %vm645_vm0, %v2571_v44 }
0x131c   : > { %3301 = vmatprep.mubr.msk.bf16.mxu0 %vm3501_vm1, %v3500_v8  ;;  %3298 = vmatpush3.bf16.msra.mxu0 %v3388_v15 }
0x131d   : > { %3299 = vmatprep.subr.bf16.mxu0 %v3500_v8 }
0x1320   : > { %3300 = vmatpush3.bf16.msra.mxu0 %v3389_v16 }
0x1321   : > { %3305 = vmatprep.subr.bf16.mxu0 %v3500_v8 }
0x13db   : > { %v2634_v50 = vpop.f32.mrf.mxu0 }
0x13dc   : > { %v2635_v51 = vadd.f32 %v3047_v49, %v2634_v50 }
0x13dd   : > { %v3283_v52 = vpop.f32.mrf.mxu0 }
0x13de   : > { %v2640_v53 = vmul.f32 %v2635_v51, %v2635_v51 }
0x13df   : > { %v2637_v55 = vpop.f32.mrf.mxu0 }
0x13e0   : > { %v2641_v56 = vmul.f32 %v2640_v53, %v2635_v51 }
0x13e1   : > { %v3284_v54 = vpop.f32.mrf.mxu0 }
0x13e2   : > { %v2642_v57 = vmul.f32 0.044715, %v2641_v56 }
0x13e4   : > { %v2643_v59 = vadd.f32 %v2642_v57, %v2635_v51 }
0x13e6   : > { %v2644_v60 = vmul.f32 0.7978846, %v2643_v59 }
0x13e8   : > { %3434 = vtanh.f32 %v2644_v60 }
0x13f5   : > { %v3435_v61 = vpop.eup %3434 }
0x13f6   : > { %v2646_v62 = vadd.f32 1.0, %v3435_v61 }
0x13f8   : > { %v2647_v63 = vmul.f32 0.5, %v2646_v62 }
0x13fa   : > { %v2648_v0 = vmul.f32 %v2647_v63, %v2635_v51 }
0x13fc   : > { %v2649_v1 = vpack.c.bf16 %v2648_v0, %v2648_v0 }
0x13fe   : > { %3294 = vmatmul.mubr.msk.bf16.vlgmr.msra.gmra.mxu1 %vm1645_vm5, %v2649_v1 }
0x14be   : > { %v2728_v2 = vpop.f32.mrf.mxu1 }
0x14bf   : > { %v2729_v3 = vadd.f32 %v3060_v18, %v2728_v2 }
0x14c0   : > { %v3295_v4 = vpop.f32.mrf.mxu1 }
0x14c1   : > { %v2734_v5 = vadd.f32 %v2729_v3, %v2570_v43 }
0x14c2   : > { %v2731_v6 = vpop.f32.mrf.mxu1 }
0x14c3   : > { %v2739_v7 = vsel %vm645_vm0, %v2734_v5, 0.0 }
0x14c4   : > { %2740 = vadd.xlane.f32.xlu0 %v2739_v7  ;;  %v3296_v9 = vpop.f32.mrf.mxu1 }
0x154d   : > { %v2741_v10 = vpop.xlane.xlu0 %2740 }
0x154e   : > { %v2742_v11 = vmul.f32 0.03125, %v2741_v10 }
0x1550   : > { %v2743_v12 = vsub.f32 %v2734_v5, %v2742_v11 }
0x1552   : > { %v2744_v13 = vmul.f32 %v2743_v12, %v2743_v12 }
0x1554   : > { %v2745_v14 = vsel %vm645_vm0, %v2744_v13, 0.0 }
0x1555   : > { %2746 = vadd.xlane.f32.xlu0 %v2745_v14 }
0x15de   : > { %v2747_v17 = vpop.xlane.xlu0 %2746 }
0x15df   : > { %v2748_v19 = vmul.f32 0.03125, %v2747_v17 }
0x15e1   : > { %v2749_v20 = vadd.f32 1e-05, %v2748_v19 }
0x15e3   : > { %3436 = vrsqrt.f32 %v2749_v20 }
0x15f0   : > { %v3437_v21 = vpop.eup %3436 }
0x15f1   : > { %v2751_v24 = vmul.f32 %v3437_v21, %v2743_v12 }
0x15f3   : > { %v2758_v26 = vmul.f32 %v3068_v23, %v2751_v24 }
0x15f5   : > { %v2765_v27 = vadd.f32 %v3069_v25, %v2758_v26 }
0x15f7   : > { %v2766_v28 = vpack.c.bf16 %v2765_v27, %v2765_v27 }
0x15f9   : > { %3302 = vmatmul.mubr.msk.bf16.vlgmr.msra.gmra.mxu0 %vm645_vm0, %v2766_v28 }
0x15fa   : > { %3309 = vmatprep.mubr.msk.bf16.mxu0 %vm3501_vm1, %v3500_v8  ;;  %3306 = vmatpush3.bf16.msra.mxu0 %v3390_v29 }
0x15fb   : > { %3307 = vmatprep.subr.bf16.mxu0 %v3500_v8  ;;  %v2833_v8 = vld [vmem:[%s4116_s19] sm:$0x1] }
0x15fe   : > { %3308 = vmatpush3.bf16.msra.mxu0 %v3391_v30 }
0x16b9   : > { %v2821_v32 = vpop.f32.mrf.mxu0 }
0x16ba   : > { %v2822_v22 = vadd.f32 %v2821_v32, %v2771_v31 }
0x16bb   : > { %v3303_v33 = vpop.f32.mrf.mxu0 }
0x16bc   : > { %v2827_v35 = vmax.f32 %v2822_v22, 0.0 }
0x16bd   : > { %v2824_v58 = vpop.f32.mrf.mxu0 }
0x16be   : > { %v2828_v36 = vpack.c.bf16 %v2827_v35, %v2827_v35 }
0x16bf   : > { %v3304_v37 = vpop.f32.mrf.mxu0 }
0x16c0   : > { %3310 = vmatmul.mubr.msk.bf16.vlgmr.msra.gmra.mxu0 %vm645_vm0, %v2828_v36 }
0x1780   : > { %v2883_v38 = vpop.f32.mrf.mxu0 }
0x1781   : > { %v2884_v34 = vadd.f32 %v2883_v38, %v2833_v8 }
0x1782   : > { %v3311_v39 = vpop.f32.mrf.mxu0 }
0x1783   : > { %2889 = vst [vmem:[%s630_s30] sm:$0x1] %v2884_v34 }
0x1784   : > { %v2886_v40 = vpop.f32.mrf.mxu0 }
0x1785   : > { %3451 = shalt.err (!%p3448_p3)
}
0x1786   : > { %s3452_s21 = scalar_lea.hbm %s4056_s25, 16  ;;  %s3456_s28 = scalar_lea.hbm %s4117_s20, 32 }
0x1787   : > { %p3453_p4 = scmp.ne.s32.totalorder %s4056_s25, %s3452_s21  ;;  %p3457_p9 = scmp.lt.s32.totalorder %s4056_s25, %s4117_s20 }
0x1788   : > { %p3458_p10 = scmp.lt.s32.totalorder %s3456_s28, %s3452_s21 }
0x1789   : > { %p3454_p7 = pnand %p3453_p4, %p3660_p5 }
0x178a   : > { %p3459_p11 = por %p3458_p10, %p3457_p9 }
0x178b   : > { %p3455_p8 = pneg %p3454_p7 }
0x178d   : > { %p3460_p12 = pnand %p3459_p11, %p3455_p8 }
0x178f   : > { %3463 = shalt.err (!%p3460_p12)
}
0x1790   : > { %3313 = dma.vmem_to_hbm [thread:$0]  (%p3660_p5), %s4058_s29, 16, %s4056_s25, %s2891_s23   ;;  %v3312_v41 = vpop.f32.mrf.mxu0 }
0x1791 PF: > { %p3319_p13 = scmp.ge.s32.totalorder %s3498_s24, 2  ;;  %s2915_s27 = sand.u32 1, %s3486_s1  }
0x1792   : > { %s2916_s5 = scalar_lea.sflag [#allocation3], %s2915_s27 }
0x1793   : > { %p3316_p0 = pnand %p3319_p13, %p3664_p6 }
0x1795   : > { %p3317_p1 = pneg %p3316_p0 }
0x1797   : > { %3481 = dma.done.wait (%p3317_p1), %s2916_s5, 16  }
0x1798   : > { %3483 = vsyncadd (%p3317_p1), %s2916_s5, 4294967280  ;;  %s4167_s24 = sld [smem:[#allocation6_spill]]  ;;  %s4170_s1 = smov %s3490_s22 }
0x1799   : > { %s4168_s0 = sld [smem:[#allocation5_spill]] }
0x179a   : > { %s4169_s23 = sld [smem:[#allocation7_spill]] }
0x179e   : > { %p30_p2 = scmp.ge.s32.totalorder %s4167_s24, 4  }
0x179f   : > { %s4171_s22 = smov %s4168_s0 }
0x17a0   :  { %32 = sbr.rel (!%p30_p2) target bundleno = 10 (0xa), region = 150 }
0x17a5   :  { %2920 = vsyncpa [#allocation3], 1 }
0x17a6   :  { %2922 = vsyncpa [#allocation3 + $0x1], 1 }

</bundles_post_ra>
